<compile_context>
chip_gen: v5e
topology: v5e:2x2
jax: 0.10.0
libtpu: 0.0.40
codegen_flags: <defaults>
</compile_context>

<pallas_src>
import functools
import math

import jax
import jax.numpy as jnp
from jax.experimental import pallas as pl
from jax.experimental.pallas import tpu as pltpu


# ---------------------------------------------------------------------------
# helpers
# ---------------------------------------------------------------------------

def _round_up(x, m):
    return ((x + m - 1) // m) * m


def _row_grid(rows, tm_max=256):
    # Row tile: multiple of 8 (f32 sublanes), capped at tm_max.  Either the block
    # equals the (padded) array or tm == tm_max, so sublane tiling is always legal.
    tm = min(tm_max, _round_up(rows, 8))
    padded = _round_up(rows, tm)
    return tm, padded


def _pad_rows(x2, padded_rows):
    rows = x2.shape[0]
    if padded_rows != rows:
        x2 = jnp.pad(x2, ((0, padded_rows - rows), (0, 0)))
    return x2


# ---------------------------------------------------------------------------
# kernels
# ---------------------------------------------------------------------------

def _linear_kernel(x_ref, w_ref, b_ref, o_ref):
    # x_ref: (TM, K) f32, w_ref: (K, N) bf16, b_ref: (1, N) f32, o_ref: (TM, N) bf16
    x = x_ref[...].astype(jnp.bfloat16)
    acc = jnp.dot(x, w_ref[...], preferred_element_type=jnp.float32)
    o_ref[...] = (acc + b_ref[...]).astype(o_ref.dtype)


def _layer_norm_f32(y, g, b, eps):
    # y: (TM, D) f32; g/b: (1, D) f32.  Unbiased std (matches torch.Tensor.std()).
    d = y.shape[-1]
    mean = jnp.mean(y, axis=-1, keepdims=True)
    diff = y - mean
    var = jnp.sum(diff * diff, axis=-1, keepdims=True) / jnp.float32(d - 1)
    std = jnp.sqrt(var)
    inv = pl.reciprocal(std + eps, approx=True)        # EUP slot, frees the VPU
    return g * diff * inv + b


def _oproj_add_norm_kernel(ctx_ref, resid_ref, wo_ref, bo_ref, g_ref, b_ref,
                           o_ref, *, eps):
    # Fused attention-output projection + residual add + LayerNorm.
    # ctx_ref: (TM, D) bf16, resid_ref: (TM, D) f32, wo_ref: (D, D) bf16.
    y = jnp.dot(ctx_ref[...], wo_ref[...],
                preferred_element_type=jnp.float32) + bo_ref[...]
    normed = _layer_norm_f32(y, g_ref[...], b_ref[...], eps)
    o_ref[...] = (resid_ref[...] + normed).astype(o_ref.dtype)


def _ffn_add_norm_kernel(x_ref, w1_ref, b1_ref, w2_ref, b2_ref, g_ref, b_ref,
                         o_ref, *, eps):
    # Fused Linear -> ReLU -> Linear -> LayerNorm -> residual add.  The (TM, F)
    # intermediate stays in VMEM; x is both the matmul input and the residual.
    x = x_ref[...]
    hid = jnp.dot(x.astype(jnp.bfloat16), w1_ref[...],
                  preferred_element_type=jnp.float32) + b1_ref[...]
    hid = jnp.maximum(hid, 0.0)
    y = jnp.dot(hid.astype(jnp.bfloat16), w2_ref[...],
                preferred_element_type=jnp.float32) + b2_ref[...]
    normed = _layer_norm_f32(y, g_ref[...], b_ref[...], eps)
    o_ref[...] = (x + normed).astype(o_ref.dtype)


def _attend_all_heads(q, k, v, masked_out, h, scale):
    # q: (Sq, D) bf16, k/v: (Sk, D) bf16, masked_out: (Mq, Sk) bool (True -> -1e9).
    # Heads are split with static lane slices; the concatenated result gives a
    # single lane-dense (Sq, D) store in the caller.
    D = q.shape[-1]
    dk = D // h
    outs = []
    for head in range(h):
        sl = slice(head * dk, (head + 1) * dk)
        s = jnp.einsum("qd,kd->qk", q[:, sl], k[:, sl],
                       preferred_element_type=jnp.float32) * scale
        s = jnp.where(masked_out, jnp.float32(-1e9), s)
        m = jnp.max(s, axis=-1, keepdims=True)
        p = jnp.exp(s - m)
        p = p * pl.reciprocal(jnp.sum(p, axis=-1, keepdims=True), approx=True)
        outs.append(jnp.einsum("qk,kd->qd", p.astype(jnp.bfloat16), v[:, sl],
                               preferred_element_type=jnp.float32))
    return jnp.concatenate(outs, axis=-1)               # (Sq, D) f32


def _self_mha_kernel(mask_ref, qkv_ref, o_ref, *, h, scale):
    # qkv_ref: (1, S, 3D) bf16 (packed q|k|v), mask_ref: (1, Mq, S) int32.
    qkv = qkv_ref[0]
    D = qkv.shape[-1] // 3
    q, k, v = qkv[:, :D], qkv[:, D:2 * D], qkv[:, 2 * D:]
    masked_out = mask_ref[0] == 0
    o_ref[0] = _attend_all_heads(q, k, v, masked_out, h, scale).astype(o_ref.dtype)


def _cross_mha_kernel(mask_ref, q_ref, kv_ref, o_ref, *, h, scale):
    # q_ref: (1, Sq, D) bf16, kv_ref: (1, Sk, 2D) bf16 (packed k|v).
    q = q_ref[0]
    kv = kv_ref[0]
    D = q.shape[-1]
    k, v = kv[:, :D], kv[:, D:]
    masked_out = mask_ref[0] == 0
    o_ref[0] = _attend_all_heads(q, k, v, masked_out, h, scale).astype(o_ref.dtype)


# ---------------------------------------------------------------------------
# pallas_call wrappers
# ---------------------------------------------------------------------------

def pallas_linear(x2, w, b, *, out_dtype=jnp.bfloat16, tm_max=256):
    rows, K = x2.shape
    N = w.shape[1]
    tm, padded = _row_grid(rows, tm_max)
    x2p = _pad_rows(x2, padded)
    # TODO(synk): pl.Buffered(1) on the grid-invariant weight/bias specs would
    # halve their VMEM footprint at realistic sizes; default buffering is fine here.
    out = pl.pallas_call(
        _linear_kernel,
        out_shape=jax.ShapeDtypeStruct((padded, N), out_dtype),
        grid_spec=pltpu.PrefetchScalarGridSpec(
            num_scalar_prefetch=0,
            grid=(padded // tm,),
            in_specs=[
                pl.BlockSpec((tm, K), lambda i: (i, 0)),   # activation row tile
                pl.BlockSpec((K, N), lambda i: (0, 0)),    # resident bf16 weight
                pl.BlockSpec((1, N), lambda i: (0, 0)),    # bias row
            ],
            out_specs=pl.BlockSpec((tm, N), lambda i: (i, 0)),
        ),
        compiler_params=pltpu.CompilerParams(
            dimension_semantics=("parallel",)),
        cost_estimate=pl.CostEstimate(
            flops=2 * padded * K * N,
            transcendentals=0,
            bytes_accessed=4 * padded * K + 2 * K * N + 4 * N + 2 * padded * N),
    )(x2p, w, b.reshape(1, N))
    return out[:rows]


def pallas_oproj_add_norm(ctx2, resid2, wo, bo, gamma, beta, *, eps=1e-6,
                          tm_max=256):
    rows, D = resid2.shape
    tm, padded = _row_grid(rows, tm_max)
    ctx2p = _pad_rows(ctx2, padded)
    resid2p = _pad_rows(resid2, padded)
    kernel = functools.partial(_oproj_add_norm_kernel, eps=eps)
    out = pl.pallas_call(
        kernel,
        out_shape=jax.ShapeDtypeStruct((padded, D), jnp.float32),
        grid_spec=pltpu.PrefetchScalarGridSpec(
            num_scalar_prefetch=0,
            grid=(padded // tm,),
            in_specs=[
                pl.BlockSpec((tm, D), lambda i: (i, 0)),   # attention context (bf16)
                pl.BlockSpec((tm, D), lambda i: (i, 0)),   # residual (f32)
                pl.BlockSpec((D, D), lambda i: (0, 0)),    # wo (bf16)
                pl.BlockSpec((1, D), lambda i: (0, 0)),    # bo
                pl.BlockSpec((1, D), lambda i: (0, 0)),    # gamma
                pl.BlockSpec((1, D), lambda i: (0, 0)),    # beta
            ],
            out_specs=pl.BlockSpec((tm, D), lambda i: (i, 0)),
        ),
        compiler_params=pltpu.CompilerParams(
            dimension_semantics=("parallel",)),
        cost_estimate=pl.CostEstimate(
            flops=2 * padded * D * D,
            transcendentals=2 * padded,
            bytes_accessed=10 * padded * D + 2 * D * D + 12 * D),
    )(ctx2p, resid2p, wo, bo.reshape(1, D), gamma.reshape(1, D),
      beta.reshape(1, D))
    return out[:rows]


def pallas_ffn_add_norm(x2, w1, b1, w2, b2, gamma, beta, *, eps=1e-6, tm_max=256):
    rows, D = x2.shape
    F = w1.shape[1]
    tm, padded = _row_grid(rows, tm_max)
    x2p = _pad_rows(x2, padded)
    kernel = functools.partial(_ffn_add_norm_kernel, eps=eps)
    # TODO(synk): at realistic d_ff, add a d_ff grid axis + f32 accumulator so
    # both weight slabs need not be VMEM-resident (v7x 64 MiB), and raise
    # vmem_limit_bytes via pltpu.CompilerParams on v5e/v6e.
    out = pl.pallas_call(
        kernel,
        out_shape=jax.ShapeDtypeStruct((padded, D), jnp.float32),
        grid_spec=pltpu.PrefetchScalarGridSpec(
            num_scalar_prefetch=0,
            grid=(padded // tm,),
            in_specs=[
                pl.BlockSpec((tm, D), lambda i: (i, 0)),   # x (input & residual)
                pl.BlockSpec((D, F), lambda i: (0, 0)),    # w1 (bf16)
                pl.BlockSpec((1, F), lambda i: (0, 0)),    # b1
                pl.BlockSpec((F, D), lambda i: (0, 0)),    # w2 (bf16)
                pl.BlockSpec((1, D), lambda i: (0, 0)),    # b2
                pl.BlockSpec((1, D), lambda i: (0, 0)),    # gamma
                pl.BlockSpec((1, D), lambda i: (0, 0)),    # beta
            ],
            out_specs=pl.BlockSpec((tm, D), lambda i: (i, 0)),
        ),
        compiler_params=pltpu.CompilerParams(
            dimension_semantics=("parallel",)),
        cost_estimate=pl.CostEstimate(
            flops=4 * padded * D * F,
            transcendentals=2 * padded,
            bytes_accessed=8 * padded * D + 4 * D * F + 4 * F + 12 * D),
    )(x2p, w1, b1.reshape(1, F), w2, b2.reshape(1, D),
      gamma.reshape(1, D), beta.reshape(1, D))
    return out[:rows]


def pallas_self_attention(qkv, mask, h):
    # qkv: (B, S, 3D) bf16 packed q|k|v ; mask: (B, Mq, S) with Mq in {1, S}.
    B, S, D3 = qkv.shape
    D = D3 // 3
    dk = D // h
    Mq = mask.shape[1]
    scale = 1.0 / math.sqrt(dk)
    kernel = functools.partial(_self_mha_kernel, h=h, scale=scale)
    # TODO(synk): for long sequences, tile Sk with an online-softmax (flash)
    # inner loop and add a head/query-tile grid axis so v7x's 2nd TensorCore
    # gets work at small batch.
    return pl.pallas_call(
        kernel,
        out_shape=jax.ShapeDtypeStruct((B, S, D), jnp.bfloat16),
        grid_spec=pltpu.PrefetchScalarGridSpec(
            num_scalar_prefetch=0,
            grid=(B,),
            in_specs=[
                pl.BlockSpec((1, Mq, S), lambda b: (b, 0, 0)),
                pl.BlockSpec((1, S, D3), lambda b: (b, 0, 0)),
            ],
            out_specs=pl.BlockSpec((1, S, D), lambda b: (b, 0, 0)),
        ),
        compiler_params=pltpu.CompilerParams(
            dimension_semantics=("parallel",)),
        cost_estimate=pl.CostEstimate(
            flops=4 * B * h * S * S * dk,
            transcendentals=B * h * S * S,
            bytes_accessed=4 * B * Mq * S + 2 * B * S * (D3 + D)),
    )(mask.astype(jnp.int32), qkv)


def pallas_cross_attention(q, kv, mask, h):
    # q: (B, Sq, D) bf16 ; kv: (B, Sk, 2D) bf16 packed k|v ; mask: (B, Mq, Sk).
    B, Sq, D = q.shape
    Sk = kv.shape[1]
    dk = D // h
    Mq = mask.shape[1]
    scale = 1.0 / math.sqrt(dk)
    kernel = functools.partial(_cross_mha_kernel, h=h, scale=scale)
    return pl.pallas_call(
        kernel,
        out_shape=jax.ShapeDtypeStruct((B, Sq, D), jnp.bfloat16),
        grid_spec=pltpu.PrefetchScalarGridSpec(
            num_scalar_prefetch=0,
            grid=(B,),
            in_specs=[
                pl.BlockSpec((1, Mq, Sk), lambda b: (b, 0, 0)),
                pl.BlockSpec((1, Sq, D), lambda b: (b, 0, 0)),
                pl.BlockSpec((1, Sk, 2 * D), lambda b: (b, 0, 0)),
            ],
            out_specs=pl.BlockSpec((1, Sq, D), lambda b: (b, 0, 0)),
        ),
        compiler_params=pltpu.CompilerParams(
            dimension_semantics=("parallel",)),
        cost_estimate=pl.CostEstimate(
            flops=4 * B * h * Sq * Sk * dk,
            transcendentals=B * h * Sq * Sk,
            bytes_accessed=4 * B * Mq * Sk + 2 * B * (2 * Sq * D + 2 * Sk * D)),
    )(mask.astype(jnp.int32), q, kv)


# ---------------------------------------------------------------------------
# parameter prep (one-time fusion / bf16 cast of matmul weights)
# ---------------------------------------------------------------------------

def prepare_params(params):
    bf = jnp.bfloat16
    sa, ca = params["self_attn"], params["src_attn"]
    return dict(
        self_wqkv=jnp.concatenate([sa["wq"], sa["wk"], sa["wv"]], axis=1).astype(bf),
        self_bqkv=jnp.concatenate([sa["bq"], sa["bk"], sa["bv"]]),
        self_wo=sa["wo"].astype(bf), self_bo=sa["bo"],
        src_wq=ca["wq"].astype(bf), src_bq=ca["bq"],
        src_wkv=jnp.concatenate([ca["wk"], ca["wv"]], axis=1).astype(bf),
        src_bkv=jnp.concatenate([ca["bk"], ca["bv"]]),
        src_wo=ca["wo"].astype(bf), src_bo=ca["bo"],
        ff_w1=params["ff_w1"].astype(bf), ff_b1=params["ff_b1"],
        ff_w2=params["ff_w2"].astype(bf), ff_b2=params["ff_b2"],
        ln0_g=params["ln0_g"], ln0_b=params["ln0_b"],
        ln1_g=params["ln1_g"], ln1_b=params["ln1_b"],
        ln2_g=params["ln2_g"], ln2_b=params["ln2_b"],
    )


# ---------------------------------------------------------------------------
# decoder layer forward (Pallas)
# ---------------------------------------------------------------------------

def decoder_layer_forward(x, memory, source_mask, target_mask, p, *, h):
    B, S, D = x.shape
    Sm = memory.shape[1]
    x_rows = x.reshape(B * S, D)

    # ---- sublayer 0: masked self-attention + add & norm --------------------
    qkv = pallas_linear(x_rows, p["self_wqkv"], p["self_bqkv"]).reshape(B, S, 3 * D)
    ctx0 = pallas_self_attention(qkv, target_mask, h)              # (B, S, D) bf16
    x1_rows = pallas_oproj_add_norm(ctx0.reshape(B * S, D), x_rows,
                                    p["self_wo"], p["self_bo"],
                                    p["ln0_g"], p["ln0_b"])
    x1 = x1_rows.reshape(B, S, D)

    # ---- sublayer 1: source attention + add & norm -------------------------
    q1 = pallas_linear(x1_rows, p["src_wq"], p["src_bq"]).reshape(B, S, D)
    kv1 = pallas_linear(memory.reshape(B * Sm, D),
                        p["src_wkv"], p["src_bkv"]).reshape(B, Sm, 2 * D)
    ctx1 = pallas_cross_attention(q1, kv1, source_mask, h)         # (B, S, D) bf16
    x2_rows = pallas_oproj_add_norm(ctx1.reshape(B * S, D), x1_rows,
                                    p["src_wo"], p["src_bo"],
                                    p["ln1_g"], p["ln1_b"])

    # ---- sublayer 2: feed-forward + add & norm ------------------------------
    out_rows = pallas_ffn_add_norm(x2_rows, p["ff_w1"], p["ff_b1"],
                                   p["ff_w2"], p["ff_b2"],
                                   p["ln2_g"], p["ln2_b"])
    return out_rows.reshape(B, S, D)


# ---------------------------------------------------------------------------
# pure-JAX reference (mirrors the PyTorch module, dropout = identity, f32)
# ---------------------------------------------------------------------------

def reference_decoder_layer(x, memory, source_mask, target_mask, params, h, eps=1e-6):
    def layer_norm(y, g, b):
        mean = jnp.mean(y, axis=-1, keepdims=True)
        std = jnp.std(y, axis=-1, keepdims=True, ddof=1)   # PyTorch unbiased std
        return g * (y - mean) / (std + eps) + b

    def linear(y, w, b):
        return y @ w + b

    def mha(xq, xkv, mask, p):
        B, Sq, D = xq.shape
        Sk = xkv.shape[1]
        dk = D // h
        q = linear(xq, p["wq"], p["bq"]).reshape(B, Sq, h, dk).transpose(0, 2, 1, 3)
        k = linear(xkv, p["wk"], p["bk"]).reshape(B, Sk, h, dk).transpose(0, 2, 1, 3)
        v = linear(xkv, p["wv"], p["bv"]).reshape(B, Sk, h, dk).transpose(0, 2, 1, 3)
        scores = jnp.einsum("bhqd,bhkd->bhqk", q, k) / math.sqrt(dk)
        m = jnp.broadcast_to(mask, (B, Sq, Sk))[:, None, :, :]
        scores = jnp.where(m == 0, jnp.float32(-1e9), scores)
        p_attn = jax.nn.softmax(scores, axis=-1)
        ctx = jnp.einsum("bhqk,bhkd->bhqd", p_attn, v)
        ctx = ctx.transpose(0, 2, 1, 3).reshape(B, Sq, D)
        return linear(ctx, p["wo"], p["bo"])

    a = mha(x, x, target_mask, params["self_attn"])
    x1 = x + layer_norm(a, params["ln0_g"], params["ln0_b"])
    b = mha(x1, memory, source_mask, params["src_attn"])
    x2 = x1 + layer_norm(b, params["ln1_g"], params["ln1_b"])
    f = linear(jnp.maximum(linear(x2, params["ff_w1"], params["ff_b1"]), 0.0),
               params["ff_w2"], params["ff_b2"])
    return x2 + layer_norm(f, params["ln2_g"], params["ln2_b"])


# ---------------------------------------------------------------------------
# parameter init (mimics nn.Linear / LayerNorm defaults)
# ---------------------------------------------------------------------------

def _linear_init(key, fan_in, fan_out):
    kw, kb = jax.random.split(key)
    bound = 1.0 / math.sqrt(fan_in)
    w = jax.random.uniform(kw, (fan_in, fan_out), minval=-bound, maxval=bound,
                           dtype=jnp.float32)
    b = jax.random.uniform(kb, (fan_out,), minval=-bound, maxval=bound,
                           dtype=jnp.float32)
    return w, b


def init_params(key, d_model, d_ff):
    keys = jax.random.split(key, 6)

    def attn_params(k):
        ks = jax.random.split(k, 4)
        wq, bq = _linear_init(ks[0], d_model, d_model)
        wk, bk = _linear_init(ks[1], d_model, d_model)
        wv, bv = _linear_init(ks[2], d_model, d_model)
        wo, bo = _linear_init(ks[3], d_model, d_model)
        return dict(wq=wq, bq=bq, wk=wk, bk=bk, wv=wv, bv=bv, wo=wo, bo=bo)

    ff_w1, ff_b1 = _linear_init(keys[2], d_model, d_ff)
    ff_w2, ff_b2 = _linear_init(keys[3], d_ff, d_model)
    kg, kb = jax.random.split(keys[4])
    gains = 1.0 + 0.1 * jax.random.normal(kg, (3, d_model), dtype=jnp.float32)
    biases = 0.1 * jax.random.normal(kb, (3, d_model), dtype=jnp.float32)
    return dict(
        self_attn=attn_params(keys[0]),
        src_attn=attn_params(keys[1]),
        ff_w1=ff_w1, ff_b1=ff_b1, ff_w2=ff_w2, ff_b2=ff_b2,
        ln0_g=gains[0], ln0_b=biases[0],
        ln1_g=gains[1], ln1_b=biases[1],
        ln2_g=gains[2], ln2_b=biases[2],
    )


# ---------------------------------------------------------------------------
# main
# ---------------------------------------------------------------------------

if __name__ == "__main__":
    B, S_TGT, S_SRC, D_MODEL, H, D_FF = 2, 8, 8, 32, 4, 64

    key = jax.random.PRNGKey(0)
    k_x, k_m, k_p = jax.random.split(key, 3)

    x = jax.random.normal(k_x, (B, S_TGT, D_MODEL), dtype=jnp.float32)
    memory = jax.random.normal(k_m, (B, S_SRC, D_MODEL), dtype=jnp.float32)
    target_mask = jnp.broadcast_to(
        jnp.tril(jnp.ones((S_TGT, S_TGT), jnp.int32)), (B, S_TGT, S_TGT))
    source_mask = jnp.ones((B, 1, S_SRC), jnp.int32)

    params = init_params(k_p, D_MODEL, D_FF)
    fused = prepare_params(params)

    fwd = jax.jit(functools.partial(decoder_layer_forward, h=H))
    out = fwd(x, memory, source_mask, target_mask, fused)
    out = jax.block_until_ready(out)

    ref = reference_decoder_layer(x, memory, source_mask, target_mask, params, H)
    assert out.shape == (B, S_TGT, D_MODEL)
    # bf16 MXU inputs (f32 accumulation) -> looser tolerance vs the f32 reference.
    assert jnp.allclose(out, ref, atol=5e-2, rtol=5e-2), "mismatch vs reference"
    print("KERNEL_OK")
</pallas_src>

<mosaic_0001>
module attributes {stable_mosaic.version = 11 : i64} {
  func.func @_linear_kernel(%arg0: i32, %arg1: memref<16x32xf32, #tpu.memory_space<vmem>>, %arg2: memref<32x32xbf16, #tpu.memory_space<vmem>>, %arg3: memref<1x32xf32, #tpu.memory_space<vmem>>, %arg4: memref<16x32xbf16, #tpu.memory_space<vmem>>) attributes {dimension_semantics = [#tpu.dimension_semantics<parallel>], iteration_bounds = array<i64: 1>, scalar_prefetch = 0 : i64, scratch_operands = 0 : i64, tpu.core_type = #tpu.core_type<tc>, window_params = [{transform_indices = @transform_0, window_bounds = array<i64: 16, 32>}, {pipeline_mode = #tpu.pipeline_mode<synchronous>, transform_indices = @transform_1, window_bounds = array<i64: 32, 32>}, {pipeline_mode = #tpu.pipeline_mode<synchronous>, transform_indices = @transform_2, window_bounds = array<i64: 1, 32>}, {transform_indices = @transform_3, window_bounds = array<i64: 16, 32>}]} {
    %c0 = arith.constant 0 : index
    %c0_0 = arith.constant 0 : index
    %0 = vector.load %arg1[%c0, %c0_0] : memref<16x32xf32, #tpu.memory_space<vmem>>, vector<16x32xf32>
    %1 = arith.truncf %0 : vector<16x32xf32> to vector<16x32xbf16>
    %c0_1 = arith.constant 0 : index
    %c0_2 = arith.constant 0 : index
    %2 = vector.load %arg2[%c0_1, %c0_2] : memref<32x32xbf16, #tpu.memory_space<vmem>>, vector<32x32xbf16>
    %cst = arith.constant dense<0.000000e+00> : vector<16x32xf32>
    %3 = tpu.matmul %1, %2, %cst {dimension_numbers = #tpu.dot_dimension_numbers<[1], [0], [0], [1], [0, 0, 1, 1], [], []>} : vector<16x32xbf16>, vector<32x32xbf16>, vector<16x32xf32> -> vector<16x32xf32>
    %c0_3 = arith.constant 0 : index
    %c0_4 = arith.constant 0 : index
    %4 = vector.load %arg3[%c0_3, %c0_4] : memref<1x32xf32, #tpu.memory_space<vmem>>, vector<1x32xf32>
    %5 = vector.broadcast %4 : vector<1x32xf32> to vector<16x32xf32>
    %6 = arith.addf %3, %5 : vector<16x32xf32>
    %7 = arith.truncf %6 : vector<16x32xf32> to vector<16x32xbf16>
    %c0_5 = arith.constant 0 : index
    %c0_6 = arith.constant 0 : index
    %8 = vector.load %arg4[%c0_5, %c0_6] : memref<16x32xbf16, #tpu.memory_space<vmem>>, vector<16x32xbf16>
    tpu.vector_store %arg4[%c0_5, %c0_6], %7 {strides = array<i32>} : memref<16x32xbf16, #tpu.memory_space<vmem>>, vector<16x32xbf16>,
    return
  }
  func.func @transform_0(%arg0: i32) -> (i32, i32) {
    %c0_i32 = arith.constant 0 : i32
    %c0_i32_0 = arith.constant 0 : i32
    return %arg0, %c0_i32 : i32, i32
  }
  func.func @transform_1(%arg0: i32) -> (i32, i32) {
    %c0_i32 = arith.constant 0 : i32
    %c0_i32_0 = arith.constant 0 : i32
    %c0_i32_1 = arith.constant 0 : i32
    return %c0_i32, %c0_i32_0 : i32, i32
  }
  func.func @transform_2(%arg0: i32) -> (i32, i32) {
    %c0_i32 = arith.constant 0 : i32
    %c0_i32_0 = arith.constant 0 : i32
    %c0_i32_1 = arith.constant 0 : i32
    return %c0_i32, %c0_i32_0 : i32, i32
  }
  func.func @transform_3(%arg0: i32) -> (i32, i32) {
    %c0_i32 = arith.constant 0 : i32
    %c0_i32_0 = arith.constant 0 : i32
    return %arg0, %c0_i32 : i32, i32
  }
}

module attributes {stable_mosaic.version = 11 : i64} {
  func.func @_oproj_add_norm_kernel(%arg0: i32, %arg1: memref<16x32xbf16, #tpu.memory_space<vmem>>, %arg2: memref<16x32xf32, #tpu.memory_space<vmem>>, %arg3: memref<32x32xbf16, #tpu.memory_space<vmem>>, %arg4: memref<1x32xf32, #tpu.memory_space<vmem>>, %arg5: memref<1x32xf32, #tpu.memory_space<vmem>>, %arg6: memref<1x32xf32, #tpu.memory_space<vmem>>, %arg7: memref<16x32xf32, #tpu.memory_space<vmem>>) attributes {dimension_semantics = [#tpu.dimension_semantics<parallel>], iteration_bounds = array<i64: 1>, scalar_prefetch = 0 : i64, scratch_operands = 0 : i64, tpu.core_type = #tpu.core_type<tc>, window_params = [{transform_indices = @transform_0, window_bounds = array<i64: 16, 32>}, {transform_indices = @transform_1, window_bounds = array<i64: 16, 32>}, {pipeline_mode = #tpu.pipeline_mode<synchronous>, transform_indices = @transform_2, window_bounds = array<i64: 32, 32>}, {pipeline_mode = #tpu.pipeline_mode<synchronous>, transform_indices = @transform_3, window_bounds = array<i64: 1, 32>}, {pipeline_mode = #tpu.pipeline_mode<synchronous>, transform_indices = @transform_4, window_bounds = array<i64: 1, 32>}, {pipeline_mode = #tpu.pipeline_mode<synchronous>, transform_indices = @transform_5, window_bounds = array<i64: 1, 32>}, {transform_indices = @transform_6, window_bounds = array<i64: 16, 32>}]} {
    %c0 = arith.constant 0 : index
    %c0_0 = arith.constant 0 : index
    %0 = vector.load %arg1[%c0, %c0_0] : memref<16x32xbf16, #tpu.memory_space<vmem>>, vector<16x32xbf16>
    %c0_1 = arith.constant 0 : index
    %c0_2 = arith.constant 0 : index
    %1 = vector.load %arg3[%c0_1, %c0_2] : memref<32x32xbf16, #tpu.memory_space<vmem>>, vector<32x32xbf16>
    %cst = arith.constant dense<0.000000e+00> : vector<16x32xf32>
    %2 = tpu.matmul %0, %1, %cst {dimension_numbers = #tpu.dot_dimension_numbers<[1], [0], [0], [1], [0, 0, 1, 1], [], []>} : vector<16x32xbf16>, vector<32x32xbf16>, vector<16x32xf32> -> vector<16x32xf32>
    %c0_3 = arith.constant 0 : index
    %c0_4 = arith.constant 0 : index
    %3 = vector.load %arg4[%c0_3, %c0_4] : memref<1x32xf32, #tpu.memory_space<vmem>>, vector<1x32xf32>
    %4 = vector.broadcast %3 : vector<1x32xf32> to vector<16x32xf32>
    %5 = arith.addf %2, %4 : vector<16x32xf32>
    %c0_5 = arith.constant 0 : index
    %c0_6 = arith.constant 0 : index
    %6 = vector.load %arg5[%c0_5, %c0_6] : memref<1x32xf32, #tpu.memory_space<vmem>>, vector<1x32xf32>
    %c0_7 = arith.constant 0 : index
    %c0_8 = arith.constant 0 : index
    %7 = vector.load %arg6[%c0_7, %c0_8] : memref<1x32xf32, #tpu.memory_space<vmem>>, vector<1x32xf32>
    %cst_9 = arith.constant dense<0.000000e+00> : vector<16xf32>
    %8 = vector.multi_reduction <add>, %5, %cst_9 [1] : vector<16x32xf32> to vector<16xf32>
    %9 = vector.shape_cast %8 : vector<16xf32> to vector<16x1xf32>
    %cst_10 = arith.constant 3.200000e+01 : f32
    %10 = vector.broadcast %cst_10 : f32 to vector<16x1xf32>
    %11 = arith.divf %9, %10 : vector<16x1xf32>
    %12 = vector.broadcast %11 : vector<16x1xf32> to vector<16x32xf32>
    %13 = arith.subf %5, %12 : vector<16x32xf32>
    %14 = arith.mulf %13, %13 : vector<16x32xf32>
    %cst_11 = arith.constant dense<0.000000e+00> : vector<16xf32>
    %15 = vector.multi_reduction <add>, %14, %cst_11 [1] : vector<16x32xf32> to vector<16xf32>
    %16 = vector.shape_cast %15 : vector<16xf32> to vector<16x1xf32>
    %cst_12 = arith.constant 3.100000e+01 : f32
    %17 = vector.broadcast %cst_12 : f32 to vector<16x1xf32>
    %18 = arith.divf %16, %17 : vector<16x1xf32>
    %19 = math.sqrt %18 : vector<16x1xf32>
    %cst_13 = arith.constant 9.99999997E-7 : f32
    %20 = vector.broadcast %cst_13 : f32 to vector<16x1xf32>
    %21 = arith.addf %19, %20 : vector<16x1xf32>
    %22 = tpu.reciprocal %21 {approx = true} : vector<16x1xf32> -> vector<16x1xf32>
    %23 = vector.broadcast %6 : vector<1x32xf32> to vector<16x32xf32>
    %24 = arith.mulf %23, %13 : vector<16x32xf32>
    %25 = vector.broadcast %22 : vector<16x1xf32> to vector<16x32xf32>
    %26 = arith.mulf %24, %25 : vector<16x32xf32>
    %27 = vector.broadcast %7 : vector<1x32xf32> to vector<16x32xf32>
    %28 = arith.addf %26, %27 : vector<16x32xf32>
    %c0_14 = arith.constant 0 : index
    %c0_15 = arith.constant 0 : index
    %29 = vector.load %arg2[%c0_14, %c0_15] : memref<16x32xf32, #tpu.memory_space<vmem>>, vector<16x32xf32>
    %30 = arith.addf %29, %28 : vector<16x32xf32>
    %c0_16 = arith.constant 0 : index
    %c0_17 = arith.constant 0 : index
    %31 = vector.load %arg7[%c0_16, %c0_17] : memref<16x32xf32, #tpu.memory_space<vmem>>, vector<16x32xf32>
    tpu.vector_store %arg7[%c0_16, %c0_17], %30 {strides = array<i32>} : memref<16x32xf32, #tpu.memory_space<vmem>>, vector<16x32xf32>,
    return
  }
  func.func @transform_0(%arg0: i32) -> (i32, i32) {
    %c0_i32 = arith.constant 0 : i32
    %c0_i32_0 = arith.constant 0 : i32
    return %arg0, %c0_i32 : i32, i32
  }
  func.func @transform_1(%arg0: i32) -> (i32, i32) {
    %c0_i32 = arith.constant 0 : i32
    %c0_i32_0 = arith.constant 0 : i32
    return %arg0, %c0_i32 : i32, i32
  }
  func.func @transform_2(%arg0: i32) -> (i32, i32) {
    %c0_i32 = arith.constant 0 : i32
    %c0_i32_0 = arith.constant 0 : i32
    %c0_i32_1 = arith.constant 0 : i32
    return %c0_i32, %c0_i32_0 : i32, i32
  }
  func.func @transform_3(%arg0: i32) -> (i32, i32) {
    %c0_i32 = arith.constant 0 : i32
    %c0_i32_0 = arith.constant 0 : i32
    %c0_i32_1 = arith.constant 0 : i32
    return %c0_i32, %c0_i32_0 : i32, i32
  }
  func.func @transform_4(%arg0: i32) -> (i32, i32) {
    %c0_i32 = arith.constant 0 : i32
    %c0_i32_0 = arith.constant 0 : i32
    %c0_i32_1 = arith.constant 0 : i32
    return %c0_i32, %c0_i32_0 : i32, i32
  }
  func.func @transform_5(%arg0: i32) -> (i32, i32) {
    %c0_i32 = arith.constant 0 : i32
    %c0_i32_0 = arith.constant 0 : i32
    %c0_i32_1 = arith.constant 0 : i32
    return %c0_i32, %c0_i32_0 : i32, i32
  }
  func.func @transform_6(%arg0: i32) -> (i32, i32) {
    %c0_i32 = arith.constant 0 : i32
    %c0_i32_0 = arith.constant 0 : i32
    return %arg0, %c0_i32 : i32, i32
  }
}

module attributes {stable_mosaic.version = 11 : i64} {
  func.func @_linear_kernel(%arg0: i32, %arg1: memref<16x32xf32, #tpu.memory_space<vmem>>, %arg2: memref<32x96xbf16, #tpu.memory_space<vmem>>, %arg3: memref<1x96xf32, #tpu.memory_space<vmem>>, %arg4: memref<16x96xbf16, #tpu.memory_space<vmem>>) attributes {dimension_semantics = [#tpu.dimension_semantics<parallel>], iteration_bounds = array<i64: 1>, scalar_prefetch = 0 : i64, scratch_operands = 0 : i64, tpu.core_type = #tpu.core_type<tc>, window_params = [{transform_indices = @transform_0, window_bounds = array<i64: 16, 32>}, {pipeline_mode = #tpu.pipeline_mode<synchronous>, transform_indices = @transform_1, window_bounds = array<i64: 32, 96>}, {pipeline_mode = #tpu.pipeline_mode<synchronous>, transform_indices = @transform_2, window_bounds = array<i64: 1, 96>}, {transform_indices = @transform_3, window_bounds = array<i64: 16, 96>}]} {
    %c0 = arith.constant 0 : index
    %c0_0 = arith.constant 0 : index
    %0 = vector.load %arg1[%c0, %c0_0] : memref<16x32xf32, #tpu.memory_space<vmem>>, vector<16x32xf32>
    %1 = arith.truncf %0 : vector<16x32xf32> to vector<16x32xbf16>
    %c0_1 = arith.constant 0 : index
    %c0_2 = arith.constant 0 : index
    %2 = vector.load %arg2[%c0_1, %c0_2] : memref<32x96xbf16, #tpu.memory_space<vmem>>, vector<32x96xbf16>
    %cst = arith.constant dense<0.000000e+00> : vector<16x96xf32>
    %3 = tpu.matmul %1, %2, %cst {dimension_numbers = #tpu.dot_dimension_numbers<[1], [0], [0], [1], [0, 0, 1, 1], [], []>} : vector<16x32xbf16>, vector<32x96xbf16>, vector<16x96xf32> -> vector<16x96xf32>
    %c0_3 = arith.constant 0 : index
    %c0_4 = arith.constant 0 : index
    %4 = vector.load %arg3[%c0_3, %c0_4] : memref<1x96xf32, #tpu.memory_space<vmem>>, vector<1x96xf32>
    %5 = vector.broadcast %4 : vector<1x96xf32> to vector<16x96xf32>
    %6 = arith.addf %3, %5 : vector<16x96xf32>
    %7 = arith.truncf %6 : vector<16x96xf32> to vector<16x96xbf16>
    %c0_5 = arith.constant 0 : index
    %c0_6 = arith.constant 0 : index
    %8 = vector.load %arg4[%c0_5, %c0_6] : memref<16x96xbf16, #tpu.memory_space<vmem>>, vector<16x96xbf16>
    tpu.vector_store %arg4[%c0_5, %c0_6], %7 {strides = array<i32>} : memref<16x96xbf16, #tpu.memory_space<vmem>>, vector<16x96xbf16>,
    return
  }
  func.func @transform_0(%arg0: i32) -> (i32, i32) {
    %c0_i32 = arith.constant 0 : i32
    %c0_i32_0 = arith.constant 0 : i32
    return %arg0, %c0_i32 : i32, i32
  }
  func.func @transform_1(%arg0: i32) -> (i32, i32) {
    %c0_i32 = arith.constant 0 : i32
    %c0_i32_0 = arith.constant 0 : i32
    %c0_i32_1 = arith.constant 0 : i32
    return %c0_i32, %c0_i32_0 : i32, i32
  }
  func.func @transform_2(%arg0: i32) -> (i32, i32) {
    %c0_i32 = arith.constant 0 : i32
    %c0_i32_0 = arith.constant 0 : i32
    %c0_i32_1 = arith.constant 0 : i32
    return %c0_i32, %c0_i32_0 : i32, i32
  }
  func.func @transform_3(%arg0: i32) -> (i32, i32) {
    %c0_i32 = arith.constant 0 : i32
    %c0_i32_0 = arith.constant 0 : i32
    return %arg0, %c0_i32 : i32, i32
  }
}

module attributes {stable_mosaic.version = 11 : i64} {
  func.func @_self_mha_kernel(%arg0: i32, %arg1: memref<1x8x8xi32, #tpu.memory_space<vmem>>, %arg2: memref<1x8x96xbf16, #tpu.memory_space<vmem>>, %arg3: memref<1x8x32xbf16, #tpu.memory_space<vmem>>) attributes {dimension_semantics = [#tpu.dimension_semantics<parallel>], iteration_bounds = array<i64: 2>, scalar_prefetch = 0 : i64, scratch_operands = 0 : i64, tpu.core_type = #tpu.core_type<tc>, window_params = [{transform_indices = @transform_0, window_bounds = array<i64: 1, 8, 8>}, {transform_indices = @transform_1, window_bounds = array<i64: 1, 8, 96>}, {transform_indices = @transform_2, window_bounds = array<i64: 1, 8, 32>}]} {
    %c0 = arith.constant 0 : index
    %c0_0 = arith.constant 0 : index
    %c0_1 = arith.constant 0 : index
    %0 = vector.load %arg2[%c0, %c0_0, %c0_1] : memref<1x8x96xbf16, #tpu.memory_space<vmem>>, vector<1x8x96xbf16>
    %1 = vector.shape_cast %0 : vector<1x8x96xbf16> to vector<8x96xbf16>
    %2 = vector.extract_strided_slice %1 {offsets = [0, 0], sizes = [8, 32], strides = [1, 1]} : vector<8x96xbf16> to vector<8x32xbf16>
    %3 = vector.extract_strided_slice %1 {offsets = [0, 32], sizes = [8, 32], strides = [1, 1]} : vector<8x96xbf16> to vector<8x32xbf16>
    %4 = vector.extract_strided_slice %1 {offsets = [0, 64], sizes = [8, 32], strides = [1, 1]} : vector<8x96xbf16> to vector<8x32xbf16>
    %c0_2 = arith.constant 0 : index
    %c0_3 = arith.constant 0 : index
    %c0_4 = arith.constant 0 : index
    %5 = vector.load %arg1[%c0_2, %c0_3, %c0_4] : memref<1x8x8xi32, #tpu.memory_space<vmem>>, vector<1x8x8xi32>
    %6 = vector.shape_cast %5 : vector<1x8x8xi32> to vector<8x8xi32>
    %c0_i32 = arith.constant 0 : i32
    %7 = vector.broadcast %c0_i32 : i32 to vector<8x8xi32>
    %8 = arith.cmpi eq, %6, %7 : vector<8x8xi32>
    %9 = vector.extract_strided_slice %2 {offsets = [0, 0], sizes = [8, 8], strides = [1, 1]} : vector<8x32xbf16> to vector<8x8xbf16>
    %10 = vector.extract_strided_slice %3 {offsets = [0, 0], sizes = [8, 8], strides = [1, 1]} : vector<8x32xbf16> to vector<8x8xbf16>
    "tpu.trace_start"() <{level = 10 : i32, message = "qd,kd->qk"}> : () -> ()
    %cst = arith.constant dense<0.000000e+00> : vector<8x8xf32>
    %11 = tpu.matmul %9, %10, %cst {dimension_numbers = #tpu.dot_dimension_numbers<[1], [1], [0], [0], [0, 0, 1, 0], [], []>} : vector<8x8xbf16>, vector<8x8xbf16>, vector<8x8xf32> -> vector<8x8xf32>
    "tpu.trace_stop"() : () -> ()
    %cst_5 = arith.constant 0.353553385 : f32
    %12 = vector.broadcast %cst_5 : f32 to vector<8x8xf32>
    %13 = arith.mulf %11, %12 : vector<8x8xf32>
    %cst_6 = arith.constant -1.000000e+09 : f32
    %14 = vector.broadcast %cst_6 : f32 to vector<8x8xf32>
    %15 = arith.select %8, %14, %13 : vector<8x8xi1>, vector<8x8xf32>
    %cst_7 = arith.constant dense<0xFF800000> : vector<8xf32>
    %16 = vector.multi_reduction <maximumf>, %15, %cst_7 [1] : vector<8x8xf32> to vector<8xf32>
    %17 = vector.shape_cast %16 : vector<8xf32> to vector<8x1xf32>
    %18 = vector.broadcast %17 : vector<8x1xf32> to vector<8x8xf32>
    %19 = arith.subf %15, %18 : vector<8x8xf32>
    %20 = math.exp %19 : vector<8x8xf32>
    %cst_8 = arith.constant dense<0.000000e+00> : vector<8xf32>
    %21 = vector.multi_reduction <add>, %20, %cst_8 [1] : vector<8x8xf32> to vector<8xf32>
    %22 = vector.shape_cast %21 : vector<8xf32> to vector<8x1xf32>
    %23 = tpu.reciprocal %22 {approx = true} : vector<8x1xf32> -> vector<8x1xf32>
    %24 = vector.broadcast %23 : vector<8x1xf32> to vector<8x8xf32>
    %25 = arith.mulf %20, %24 : vector<8x8xf32>
    %26 = arith.truncf %25 : vector<8x8xf32> to vector<8x8xbf16>
    %27 = vector.extract_strided_slice %4 {offsets = [0, 0], sizes = [8, 8], strides = [1, 1]} : vector<8x32xbf16> to vector<8x8xbf16>
    "tpu.trace_start"() <{level = 10 : i32, message = "qk,kd->qd"}> : () -> ()
    %cst_9 = arith.constant dense<0.000000e+00> : vector<8x8xf32>
    %28 = tpu.matmul %26, %27, %cst_9 {dimension_numbers = #tpu.dot_dimension_numbers<[1], [0], [0], [1], [0, 0, 1, 1], [], []>} : vector<8x8xbf16>, vector<8x8xbf16>, vector<8x8xf32> -> vector<8x8xf32>
    "tpu.trace_stop"() : () -> ()
    %29 = vector.extract_strided_slice %2 {offsets = [0, 8], sizes = [8, 8], strides = [1, 1]} : vector<8x32xbf16> to vector<8x8xbf16>
    %30 = vector.extract_strided_slice %3 {offsets = [0, 8], sizes = [8, 8], strides = [1, 1]} : vector<8x32xbf16> to vector<8x8xbf16>
    "tpu.trace_start"() <{level = 10 : i32, message = "qd,kd->qk"}> : () -> ()
    %cst_10 = arith.constant dense<0.000000e+00> : vector<8x8xf32>
    %31 = tpu.matmul %29, %30, %cst_10 {dimension_numbers = #tpu.dot_dimension_numbers<[1], [1], [0], [0], [0, 0, 1, 0], [], []>} : vector<8x8xbf16>, vector<8x8xbf16>, vector<8x8xf32> -> vector<8x8xf32>
    "tpu.trace_stop"() : () -> ()
    %cst_11 = arith.constant 0.353553385 : f32
    %32 = vector.broadcast %cst_11 : f32 to vector<8x8xf32>
    %33 = arith.mulf %31, %32 : vector<8x8xf32>
    %cst_12 = arith.constant -1.000000e+09 : f32
    %34 = vector.broadcast %cst_12 : f32 to vector<8x8xf32>
    %35 = arith.select %8, %34, %33 : vector<8x8xi1>, vector<8x8xf32>
    %cst_13 = arith.constant dense<0xFF800000> : vector<8xf32>
    %36 = vector.multi_reduction <maximumf>, %35, %cst_13 [1] : vector<8x8xf32> to vector<8xf32>
    %37 = vector.shape_cast %36 : vector<8xf32> to vector<8x1xf32>
    %38 = vector.broadcast %37 : vector<8x1xf32> to vector<8x8xf32>
    %39 = arith.subf %35, %38 : vector<8x8xf32>
    %40 = math.exp %39 : vector<8x8xf32>
    %cst_14 = arith.constant dense<0.000000e+00> : vector<8xf32>
    %41 = vector.multi_reduction <add>, %40, %cst_14 [1] : vector<8x8xf32> to vector<8xf32>
    %42 = vector.shape_cast %41 : vector<8xf32> to vector<8x1xf32>
    %43 = tpu.reciprocal %42 {approx = true} : vector<8x1xf32> -> vector<8x1xf32>
    %44 = vector.broadcast %43 : vector<8x1xf32> to vector<8x8xf32>
    %45 = arith.mulf %40, %44 : vector<8x8xf32>
    %46 = arith.truncf %45 : vector<8x8xf32> to vector<8x8xbf16>
    %47 = vector.extract_strided_slice %4 {offsets = [0, 8], sizes = [8, 8], strides = [1, 1]} : vector<8x32xbf16> to vector<8x8xbf16>
    "tpu.trace_start"() <{level = 10 : i32, message = "qk,kd->qd"}> : () -> ()
    %cst_15 = arith.constant dense<0.000000e+00> : vector<8x8xf32>
    %48 = tpu.matmul %46, %47, %cst_15 {dimension_numbers = #tpu.dot_dimension_numbers<[1], [0], [0], [1], [0, 0, 1, 1], [], []>} : vector<8x8xbf16>, vector<8x8xbf16>, vector<8x8xf32> -> vector<8x8xf32>
    "tpu.trace_stop"() : () -> ()
    %49 = vector.extract_strided_slice %2 {offsets = [0, 16], sizes = [8, 8], strides = [1, 1]} : vector<8x32xbf16> to vector<8x8xbf16>
    %50 = vector.extract_strided_slice %3 {offsets = [0, 16], sizes = [8, 8], strides = [1, 1]} : vector<8x32xbf16> to vector<8x8xbf16>
    "tpu.trace_start"() <{level = 10 : i32, message = "qd,kd->qk"}> : () -> ()
    %cst_16 = arith.constant dense<0.000000e+00> : vector<8x8xf32>
    %51 = tpu.matmul %49, %50, %cst_16 {dimension_numbers = #tpu.dot_dimension_numbers<[1], [1], [0], [0], [0, 0, 1, 0], [], []>} : vector<8x8xbf16>, vector<8x8xbf16>, vector<8x8xf32> -> vector<8x8xf32>
    "tpu.trace_stop"() : () -> ()
    %cst_17 = arith.constant 0.353553385 : f32
    %52 = vector.broadcast %cst_17 : f32 to vector<8x8xf32>
    %53 = arith.mulf %51, %52 : vector<8x8xf32>
    %cst_18 = arith.constant -1.000000e+09 : f32
    %54 = vector.broadcast %cst_18 : f32 to vector<8x8xf32>
    %55 = arith.select %8, %54, %53 : vector<8x8xi1>, vector<8x8xf32>
    %cst_19 = arith.constant dense<0xFF800000> : vector<8xf32>
    %56 = vector.multi_reduction <maximumf>, %55, %cst_19 [1] : vector<8x8xf32> to vector<8xf32>
    %57 = vector.shape_cast %56 : vector<8xf32> to vector<8x1xf32>
    %58 = vector.broadcast %57 : vector<8x1xf32> to vector<8x8xf32>
    %59 = arith.subf %55, %58 : vector<8x8xf32>
    %60 = math.exp %59 : vector<8x8xf32>
    %cst_20 = arith.constant dense<0.000000e+00> : vector<8xf32>
    %61 = vector.multi_reduction <add>, %60, %cst_20 [1] : vector<8x8xf32> to vector<8xf32>
    %62 = vector.shape_cast %61 : vector<8xf32> to vector<8x1xf32>
    %63 = tpu.reciprocal %62 {approx = true} : vector<8x1xf32> -> vector<8x1xf32>
    %64 = vector.broadcast %63 : vector<8x1xf32> to vector<8x8xf32>
    %65 = arith.mulf %60, %64 : vector<8x8xf32>
    %66 = arith.truncf %65 : vector<8x8xf32> to vector<8x8xbf16>
    %67 = vector.extract_strided_slice %4 {offsets = [0, 16], sizes = [8, 8], strides = [1, 1]} : vector<8x32xbf16> to vector<8x8xbf16>
    "tpu.trace_start"() <{level = 10 : i32, message = "qk,kd->qd"}> : () -> ()
    %cst_21 = arith.constant dense<0.000000e+00> : vector<8x8xf32>
    %68 = tpu.matmul %66, %67, %cst_21 {dimension_numbers = #tpu.dot_dimension_numbers<[1], [0], [0], [1], [0, 0, 1, 1], [], []>} : vector<8x8xbf16>, vector<8x8xbf16>, vector<8x8xf32> -> vector<8x8xf32>
    "tpu.trace_stop"() : () -> ()
    %69 = vector.extract_strided_slice %2 {offsets = [0, 24], sizes = [8, 8], strides = [1, 1]} : vector<8x32xbf16> to vector<8x8xbf16>
    %70 = vector.extract_strided_slice %3 {offsets = [0, 24], sizes = [8, 8], strides = [1, 1]} : vector<8x32xbf16> to vector<8x8xbf16>
    "tpu.trace_start"() <{level = 10 : i32, message = "qd,kd->qk"}> : () -> ()
    %cst_22 = arith.constant dense<0.000000e+00> : vector<8x8xf32>
    %71 = tpu.matmul %69, %70, %cst_22 {dimension_numbers = #tpu.dot_dimension_numbers<[1], [1], [0], [0], [0, 0, 1, 0], [], []>} : vector<8x8xbf16>, vector<8x8xbf16>, vector<8x8xf32> -> vector<8x8xf32>
    "tpu.trace_stop"() : () -> ()
    %cst_23 = arith.constant 0.353553385 : f32
    %72 = vector.broadcast %cst_23 : f32 to vector<8x8xf32>
    %73 = arith.mulf %71, %72 : vector<8x8xf32>
    %cst_24 = arith.constant -1.000000e+09 : f32
    %74 = vector.broadcast %cst_24 : f32 to vector<8x8xf32>
    %75 = arith.select %8, %74, %73 : vector<8x8xi1>, vector<8x8xf32>
    %cst_25 = arith.constant dense<0xFF800000> : vector<8xf32>
    %76 = vector.multi_reduction <maximumf>, %75, %cst_25 [1] : vector<8x8xf32> to vector<8xf32>
    %77 = vector.shape_cast %76 : vector<8xf32> to vector<8x1xf32>
    %78 = vector.broadcast %77 : vector<8x1xf32> to vector<8x8xf32>
    %79 = arith.subf %75, %78 : vector<8x8xf32>
    %80 = math.exp %79 : vector<8x8xf32>
    %cst_26 = arith.constant dense<0.000000e+00> : vector<8xf32>
    %81 = vector.multi_reduction <add>, %80, %cst_26 [1] : vector<8x8xf32> to vector<8xf32>
    %82 = vector.shape_cast %81 : vector<8xf32> to vector<8x1xf32>
    %83 = tpu.reciprocal %82 {approx = true} : vector<8x1xf32> -> vector<8x1xf32>
    %84 = vector.broadcast %83 : vector<8x1xf32> to vector<8x8xf32>
    %85 = arith.mulf %80, %84 : vector<8x8xf32>
    %86 = arith.truncf %85 : vector<8x8xf32> to vector<8x8xbf16>
    %87 = vector.extract_strided_slice %4 {offsets = [0, 24], sizes = [8, 8], strides = [1, 1]} : vector<8x32xbf16> to vector<8x8xbf16>
    "tpu.trace_start"() <{level = 10 : i32, message = "qk,kd->qd"}> : () -> ()
    %cst_27 = arith.constant dense<0.000000e+00> : vector<8x8xf32>
    %88 = tpu.matmul %86, %87, %cst_27 {dimension_numbers = #tpu.dot_dimension_numbers<[1], [0], [0], [1], [0, 0, 1, 1], [], []>} : vector<8x8xbf16>, vector<8x8xbf16>, vector<8x8xf32> -> vector<8x8xf32>
    "tpu.trace_stop"() : () -> ()
    %89 = tpu.concatenate %28, %48, %68, %88 in 1 : vector<8x8xf32>, vector<8x8xf32>, vector<8x8xf32>, vector<8x8xf32> -> vector<8x32xf32>
    %90 = arith.truncf %89 : vector<8x32xf32> to vector<8x32xbf16>
    %c0_28 = arith.constant 0 : index
    %c0_29 = arith.constant 0 : index
    %c0_30 = arith.constant 0 : index
    %91 = vector.load %arg3[%c0_28, %c0_29, %c0_30] : memref<1x8x32xbf16, #tpu.memory_space<vmem>>, vector<1x8x32xbf16>
    %92 = vector.shape_cast %91 : vector<1x8x32xbf16> to vector<8x32xbf16>
    %93 = vector.shape_cast %90 : vector<8x32xbf16> to vector<1x8x32xbf16>
    tpu.vector_store %arg3[%c0_28, %c0_29, %c0_30], %93 {strides = array<i32>} : memref<1x8x32xbf16, #tpu.memory_space<vmem>>, vector<1x8x32xbf16>,
    return
  }
  func.func @transform_0(%arg0: i32) -> (i32, i32, i32) {
    %c0_i32 = arith.constant 0 : i32
    %c0_i32_0 = arith.constant 0 : i32
    %c0_i32_1 = arith.constant 0 : i32
    return %arg0, %c0_i32, %c0_i32_0 : i32, i32, i32
  }
  func.func @transform_1(%arg0: i32) -> (i32, i32, i32) {
    %c0_i32 = arith.constant 0 : i32
    %c0_i32_0 = arith.constant 0 : i32
    %c0_i32_1 = arith.constant 0 : i32
    return %arg0, %c0_i32, %c0_i32_0 : i32, i32, i32
  }
  func.func @transform_2(%arg0: i32) -> (i32, i32, i32) {
    %c0_i32 = arith.constant 0 : i32
    %c0_i32_0 = arith.constant 0 : i32
    %c0_i32_1 = arith.constant 0 : i32
    return %arg0, %c0_i32, %c0_i32_0 : i32, i32, i32
  }
}

module attributes {stable_mosaic.version = 11 : i64} {
  func.func @_linear_kernel(%arg0: i32, %arg1: memref<16x32xf32, #tpu.memory_space<vmem>>, %arg2: memref<32x64xbf16, #tpu.memory_space<vmem>>, %arg3: memref<1x64xf32, #tpu.memory_space<vmem>>, %arg4: memref<16x64xbf16, #tpu.memory_space<vmem>>) attributes {dimension_semantics = [#tpu.dimension_semantics<parallel>], iteration_bounds = array<i64: 1>, scalar_prefetch = 0 : i64, scratch_operands = 0 : i64, tpu.core_type = #tpu.core_type<tc>, window_params = [{transform_indices = @transform_0, window_bounds = array<i64: 16, 32>}, {pipeline_mode = #tpu.pipeline_mode<synchronous>, transform_indices = @transform_1, window_bounds = array<i64: 32, 64>}, {pipeline_mode = #tpu.pipeline_mode<synchronous>, transform_indices = @transform_2, window_bounds = array<i64: 1, 64>}, {transform_indices = @transform_3, window_bounds = array<i64: 16, 64>}]} {
    %c0 = arith.constant 0 : index
    %c0_0 = arith.constant 0 : index
    %0 = vector.load %arg1[%c0, %c0_0] : memref<16x32xf32, #tpu.memory_space<vmem>>, vector<16x32xf32>
    %1 = arith.truncf %0 : vector<16x32xf32> to vector<16x32xbf16>
    %c0_1 = arith.constant 0 : index
    %c0_2 = arith.constant 0 : index
    %2 = vector.load %arg2[%c0_1, %c0_2] : memref<32x64xbf16, #tpu.memory_space<vmem>>, vector<32x64xbf16>
    %cst = arith.constant dense<0.000000e+00> : vector<16x64xf32>
    %3 = tpu.matmul %1, %2, %cst {dimension_numbers = #tpu.dot_dimension_numbers<[1], [0], [0], [1], [0, 0, 1, 1], [], []>} : vector<16x32xbf16>, vector<32x64xbf16>, vector<16x64xf32> -> vector<16x64xf32>
    %c0_3 = arith.constant 0 : index
    %c0_4 = arith.constant 0 : index
    %4 = vector.load %arg3[%c0_3, %c0_4] : memref<1x64xf32, #tpu.memory_space<vmem>>, vector<1x64xf32>
    %5 = vector.broadcast %4 : vector<1x64xf32> to vector<16x64xf32>
    %6 = arith.addf %3, %5 : vector<16x64xf32>
    %7 = arith.truncf %6 : vector<16x64xf32> to vector<16x64xbf16>
    %c0_5 = arith.constant 0 : index
    %c0_6 = arith.constant 0 : index
    %8 = vector.load %arg4[%c0_5, %c0_6] : memref<16x64xbf16, #tpu.memory_space<vmem>>, vector<16x64xbf16>
    tpu.vector_store %arg4[%c0_5, %c0_6], %7 {strides = array<i32>} : memref<16x64xbf16, #tpu.memory_space<vmem>>, vector<16x64xbf16>,
    return
  }
  func.func @transform_0(%arg0: i32) -> (i32, i32) {
    %c0_i32 = arith.constant 0 : i32
    %c0_i32_0 = arith.constant 0 : i32
    return %arg0, %c0_i32 : i32, i32
  }
  func.func @transform_1(%arg0: i32) -> (i32, i32) {
    %c0_i32 = arith.constant 0 : i32
    %c0_i32_0 = arith.constant 0 : i32
    %c0_i32_1 = arith.constant 0 : i32
    return %c0_i32, %c0_i32_0 : i32, i32
  }
  func.func @transform_2(%arg0: i32) -> (i32, i32) {
    %c0_i32 = arith.constant 0 : i32
    %c0_i32_0 = arith.constant 0 : i32
    %c0_i32_1 = arith.constant 0 : i32
    return %c0_i32, %c0_i32_0 : i32, i32
  }
  func.func @transform_3(%arg0: i32) -> (i32, i32) {
    %c0_i32 = arith.constant 0 : i32
    %c0_i32_0 = arith.constant 0 : i32
    return %arg0, %c0_i32 : i32, i32
  }
}

module attributes {stable_mosaic.version = 11 : i64} {
  func.func @_oproj_add_norm_kernel(%arg0: i32, %arg1: memref<16x32xbf16, #tpu.memory_space<vmem>>, %arg2: memref<16x32xf32, #tpu.memory_space<vmem>>, %arg3: memref<32x32xbf16, #tpu.memory_space<vmem>>, %arg4: memref<1x32xf32, #tpu.memory_space<vmem>>, %arg5: memref<1x32xf32, #tpu.memory_space<vmem>>, %arg6: memref<1x32xf32, #tpu.memory_space<vmem>>, %arg7: memref<16x32xf32, #tpu.memory_space<vmem>>) attributes {dimension_semantics = [#tpu.dimension_semantics<parallel>], iteration_bounds = array<i64: 1>, scalar_prefetch = 0 : i64, scratch_operands = 0 : i64, tpu.core_type = #tpu.core_type<tc>, window_params = [{transform_indices = @transform_0, window_bounds = array<i64: 16, 32>}, {transform_indices = @transform_1, window_bounds = array<i64: 16, 32>}, {pipeline_mode = #tpu.pipeline_mode<synchronous>, transform_indices = @transform_2, window_bounds = array<i64: 32, 32>}, {pipeline_mode = #tpu.pipeline_mode<synchronous>, transform_indices = @transform_3, window_bounds = array<i64: 1, 32>}, {pipeline_mode = #tpu.pipeline_mode<synchronous>, transform_indices = @transform_4, window_bounds = array<i64: 1, 32>}, {pipeline_mode = #tpu.pipeline_mode<synchronous>, transform_indices = @transform_5, window_bounds = array<i64: 1, 32>}, {transform_indices = @transform_6, window_bounds = array<i64: 16, 32>}]} {
    %c0 = arith.constant 0 : index
    %c0_0 = arith.constant 0 : index
    %0 = vector.load %arg1[%c0, %c0_0] : memref<16x32xbf16, #tpu.memory_space<vmem>>, vector<16x32xbf16>
    %c0_1 = arith.constant 0 : index
    %c0_2 = arith.constant 0 : index
    %1 = vector.load %arg3[%c0_1, %c0_2] : memref<32x32xbf16, #tpu.memory_space<vmem>>, vector<32x32xbf16>
    %cst = arith.constant dense<0.000000e+00> : vector<16x32xf32>
    %2 = tpu.matmul %0, %1, %cst {dimension_numbers = #tpu.dot_dimension_numbers<[1], [0], [0], [1], [0, 0, 1, 1], [], []>} : vector<16x32xbf16>, vector<32x32xbf16>, vector<16x32xf32> -> vector<16x32xf32>
    %c0_3 = arith.constant 0 : index
    %c0_4 = arith.constant 0 : index
    %3 = vector.load %arg4[%c0_3, %c0_4] : memref<1x32xf32, #tpu.memory_space<vmem>>, vector<1x32xf32>
    %4 = vector.broadcast %3 : vector<1x32xf32> to vector<16x32xf32>
    %5 = arith.addf %2, %4 : vector<16x32xf32>
    %c0_5 = arith.constant 0 : index
    %c0_6 = arith.constant 0 : index
    %6 = vector.load %arg5[%c0_5, %c0_6] : memref<1x32xf32, #tpu.memory_space<vmem>>, vector<1x32xf32>
    %c0_7 = arith.constant 0 : index
    %c0_8 = arith.constant 0 : index
    %7 = vector.load %arg6[%c0_7, %c0_8] : memref<1x32xf32, #tpu.memory_space<vmem>>, vector<1x32xf32>
    %cst_9 = arith.constant dense<0.000000e+00> : vector<16xf32>
    %8 = vector.multi_reduction <add>, %5, %cst_9 [1] : vector<16x32xf32> to vector<16xf32>
    %9 = vector.shape_cast %8 : vector<16xf32> to vector<16x1xf32>
    %cst_10 = arith.constant 3.200000e+01 : f32
    %10 = vector.broadcast %cst_10 : f32 to vector<16x1xf32>
    %11 = arith.divf %9, %10 : vector<16x1xf32>
    %12 = vector.broadcast %11 : vector<16x1xf32> to vector<16x32xf32>
    %13 = arith.subf %5, %12 : vector<16x32xf32>
    %14 = arith.mulf %13, %13 : vector<16x32xf32>
    %cst_11 = arith.constant dense<0.000000e+00> : vector<16xf32>
    %15 = vector.multi_reduction <add>, %14, %cst_11 [1] : vector<16x32xf32> to vector<16xf32>
    %16 = vector.shape_cast %15 : vector<16xf32> to vector<16x1xf32>
    %cst_12 = arith.constant 3.100000e+01 : f32
    %17 = vector.broadcast %cst_12 : f32 to vector<16x1xf32>
    %18 = arith.divf %16, %17 : vector<16x1xf32>
    %19 = math.sqrt %18 : vector<16x1xf32>
    %cst_13 = arith.constant 9.99999997E-7 : f32
    %20 = vector.broadcast %cst_13 : f32 to vector<16x1xf32>
    %21 = arith.addf %19, %20 : vector<16x1xf32>
    %22 = tpu.reciprocal %21 {approx = true} : vector<16x1xf32> -> vector<16x1xf32>
    %23 = vector.broadcast %6 : vector<1x32xf32> to vector<16x32xf32>
    %24 = arith.mulf %23, %13 : vector<16x32xf32>
    %25 = vector.broadcast %22 : vector<16x1xf32> to vector<16x32xf32>
    %26 = arith.mulf %24, %25 : vector<16x32xf32>
    %27 = vector.broadcast %7 : vector<1x32xf32> to vector<16x32xf32>
    %28 = arith.addf %26, %27 : vector<16x32xf32>
    %c0_14 = arith.constant 0 : index
    %c0_15 = arith.constant 0 : index
    %29 = vector.load %arg2[%c0_14, %c0_15] : memref<16x32xf32, #tpu.memory_space<vmem>>, vector<16x32xf32>
    %30 = arith.addf %29, %28 : vector<16x32xf32>
    %c0_16 = arith.constant 0 : index
    %c0_17 = arith.constant 0 : index
    %31 = vector.load %arg7[%c0_16, %c0_17] : memref<16x32xf32, #tpu.memory_space<vmem>>, vector<16x32xf32>
    tpu.vector_store %arg7[%c0_16, %c0_17], %30 {strides = array<i32>} : memref<16x32xf32, #tpu.memory_space<vmem>>, vector<16x32xf32>,
    return
  }
  func.func @transform_0(%arg0: i32) -> (i32, i32) {
    %c0_i32 = arith.constant 0 : i32
    %c0_i32_0 = arith.constant 0 : i32
    return %arg0, %c0_i32 : i32, i32
  }
  func.func @transform_1(%arg0: i32) -> (i32, i32) {
    %c0_i32 = arith.constant 0 : i32
    %c0_i32_0 = arith.constant 0 : i32
    return %arg0, %c0_i32 : i32, i32
  }
  func.func @transform_2(%arg0: i32) -> (i32, i32) {
    %c0_i32 = arith.constant 0 : i32
    %c0_i32_0 = arith.constant 0 : i32
    %c0_i32_1 = arith.constant 0 : i32
    return %c0_i32, %c0_i32_0 : i32, i32
  }
  func.func @transform_3(%arg0: i32) -> (i32, i32) {
    %c0_i32 = arith.constant 0 : i32
    %c0_i32_0 = arith.constant 0 : i32
    %c0_i32_1 = arith.constant 0 : i32
    return %c0_i32, %c0_i32_0 : i32, i32
  }
  func.func @transform_4(%arg0: i32) -> (i32, i32) {
    %c0_i32 = arith.constant 0 : i32
    %c0_i32_0 = arith.constant 0 : i32
    %c0_i32_1 = arith.constant 0 : i32
    return %c0_i32, %c0_i32_0 : i32, i32
  }
  func.func @transform_5(%arg0: i32) -> (i32, i32) {
    %c0_i32 = arith.constant 0 : i32
    %c0_i32_0 = arith.constant 0 : i32
    %c0_i32_1 = arith.constant 0 : i32
    return %c0_i32, %c0_i32_0 : i32, i32
  }
  func.func @transform_6(%arg0: i32) -> (i32, i32) {
    %c0_i32 = arith.constant 0 : i32
    %c0_i32_0 = arith.constant 0 : i32
    return %arg0, %c0_i32 : i32, i32
  }
}

module attributes {stable_mosaic.version = 11 : i64} {
  func.func @_cross_mha_kernel(%arg0: i32, %arg1: memref<1x1x8xi32, #tpu.memory_space<vmem>>, %arg2: memref<1x8x32xbf16, #tpu.memory_space<vmem>>, %arg3: memref<1x8x64xbf16, #tpu.memory_space<vmem>>, %arg4: memref<1x8x32xbf16, #tpu.memory_space<vmem>>) attributes {dimension_semantics = [#tpu.dimension_semantics<parallel>], iteration_bounds = array<i64: 2>, scalar_prefetch = 0 : i64, scratch_operands = 0 : i64, tpu.core_type = #tpu.core_type<tc>, window_params = [{transform_indices = @transform_0, window_bounds = array<i64: 1, 1, 8>}, {transform_indices = @transform_1, window_bounds = array<i64: 1, 8, 32>}, {transform_indices = @transform_2, window_bounds = array<i64: 1, 8, 64>}, {transform_indices = @transform_3, window_bounds = array<i64: 1, 8, 32>}]} {
    %c0 = arith.constant 0 : index
    %c0_0 = arith.constant 0 : index
    %c0_1 = arith.constant 0 : index
    %0 = vector.load %arg2[%c0, %c0_0, %c0_1] : memref<1x8x32xbf16, #tpu.memory_space<vmem>>, vector<1x8x32xbf16>
    %1 = vector.shape_cast %0 : vector<1x8x32xbf16> to vector<8x32xbf16>
    %c0_2 = arith.constant 0 : index
    %c0_3 = arith.constant 0 : index
    %c0_4 = arith.constant 0 : index
    %2 = vector.load %arg3[%c0_2, %c0_3, %c0_4] : memref<1x8x64xbf16, #tpu.memory_space<vmem>>, vector<1x8x64xbf16>
    %3 = vector.shape_cast %2 : vector<1x8x64xbf16> to vector<8x64xbf16>
    %4 = vector.extract_strided_slice %3 {offsets = [0, 0], sizes = [8, 32], strides = [1, 1]} : vector<8x64xbf16> to vector<8x32xbf16>
    %5 = vector.extract_strided_slice %3 {offsets = [0, 32], sizes = [8, 32], strides = [1, 1]} : vector<8x64xbf16> to vector<8x32xbf16>
    %c0_5 = arith.constant 0 : index
    %c0_6 = arith.constant 0 : index
    %c0_7 = arith.constant 0 : index
    %6 = vector.load %arg1[%c0_5, %c0_6, %c0_7] : memref<1x1x8xi32, #tpu.memory_space<vmem>>, vector<1x1x8xi32>
    %7 = vector.shape_cast %6 : vector<1x1x8xi32> to vector<1x8xi32>
    %c0_i32 = arith.constant 0 : i32
    %8 = vector.broadcast %c0_i32 : i32 to vector<1x8xi32>
    %9 = arith.cmpi eq, %7, %8 : vector<1x8xi32>
    %10 = vector.extract_strided_slice %1 {offsets = [0, 0], sizes = [8, 8], strides = [1, 1]} : vector<8x32xbf16> to vector<8x8xbf16>
    %11 = vector.extract_strided_slice %4 {offsets = [0, 0], sizes = [8, 8], strides = [1, 1]} : vector<8x32xbf16> to vector<8x8xbf16>
    "tpu.trace_start"() <{level = 10 : i32, message = "qd,kd->qk"}> : () -> ()
    %cst = arith.constant dense<0.000000e+00> : vector<8x8xf32>
    %12 = tpu.matmul %10, %11, %cst {dimension_numbers = #tpu.dot_dimension_numbers<[1], [1], [0], [0], [0, 0, 1, 0], [], []>} : vector<8x8xbf16>, vector<8x8xbf16>, vector<8x8xf32> -> vector<8x8xf32>
    "tpu.trace_stop"() : () -> ()
    %cst_8 = arith.constant 0.353553385 : f32
    %13 = vector.broadcast %cst_8 : f32 to vector<8x8xf32>
    %14 = arith.mulf %12, %13 : vector<8x8xf32>
    %cst_9 = arith.constant -1.000000e+09 : f32
    %15 = vector.shape_cast %9 : vector<1x8xi1> to vector<1x8xi1>
    %16 = vector.broadcast %15 : vector<1x8xi1> to vector<8x8xi1>
    %17 = vector.broadcast %cst_9 : f32 to vector<8x8xf32>
    %18 = arith.select %16, %17, %14 : vector<8x8xi1>, vector<8x8xf32>
    %cst_10 = arith.constant dense<0xFF800000> : vector<8xf32>
    %19 = vector.multi_reduction <maximumf>, %18, %cst_10 [1] : vector<8x8xf32> to vector<8xf32>
    %20 = vector.shape_cast %19 : vector<8xf32> to vector<8x1xf32>
    %21 = vector.broadcast %20 : vector<8x1xf32> to vector<8x8xf32>
    %22 = arith.subf %18, %21 : vector<8x8xf32>
    %23 = math.exp %22 : vector<8x8xf32>
    %cst_11 = arith.constant dense<0.000000e+00> : vector<8xf32>
    %24 = vector.multi_reduction <add>, %23, %cst_11 [1] : vector<8x8xf32> to vector<8xf32>
    %25 = vector.shape_cast %24 : vector<8xf32> to vector<8x1xf32>
    %26 = tpu.reciprocal %25 {approx = true} : vector<8x1xf32> -> vector<8x1xf32>
    %27 = vector.broadcast %26 : vector<8x1xf32> to vector<8x8xf32>
    %28 = arith.mulf %23, %27 : vector<8x8xf32>
    %29 = arith.truncf %28 : vector<8x8xf32> to vector<8x8xbf16>
    %30 = vector.extract_strided_slice %5 {offsets = [0, 0], sizes = [8, 8], strides = [1, 1]} : vector<8x32xbf16> to vector<8x8xbf16>
    "tpu.trace_start"() <{level = 10 : i32, message = "qk,kd->qd"}> : () -> ()
    %cst_12 = arith.constant dense<0.000000e+00> : vector<8x8xf32>
    %31 = tpu.matmul %29, %30, %cst_12 {dimension_numbers = #tpu.dot_dimension_numbers<[1], [0], [0], [1], [0, 0, 1, 1], [], []>} : vector<8x8xbf16>, vector<8x8xbf16>, vector<8x8xf32> -> vector<8x8xf32>
    "tpu.trace_stop"() : () -> ()
    %32 = vector.extract_strided_slice %1 {offsets = [0, 8], sizes = [8, 8], strides = [1, 1]} : vector<8x32xbf16> to vector<8x8xbf16>
    %33 = vector.extract_strided_slice %4 {offsets = [0, 8], sizes = [8, 8], strides = [1, 1]} : vector<8x32xbf16> to vector<8x8xbf16>
    "tpu.trace_start"() <{level = 10 : i32, message = "qd,kd->qk"}> : () -> ()
    %cst_13 = arith.constant dense<0.000000e+00> : vector<8x8xf32>
    %34 = tpu.matmul %32, %33, %cst_13 {dimension_numbers = #tpu.dot_dimension_numbers<[1], [1], [0], [0], [0, 0, 1, 0], [], []>} : vector<8x8xbf16>, vector<8x8xbf16>, vector<8x8xf32> -> vector<8x8xf32>
    "tpu.trace_stop"() : () -> ()
    %cst_14 = arith.constant 0.353553385 : f32
    %35 = vector.broadcast %cst_14 : f32 to vector<8x8xf32>
    %36 = arith.mulf %34, %35 : vector<8x8xf32>
    %cst_15 = arith.constant -1.000000e+09 : f32
    %37 = vector.shape_cast %9 : vector<1x8xi1> to vector<1x8xi1>
    %38 = vector.broadcast %37 : vector<1x8xi1> to vector<8x8xi1>
    %39 = vector.broadcast %cst_15 : f32 to vector<8x8xf32>
    %40 = arith.select %38, %39, %36 : vector<8x8xi1>, vector<8x8xf32>
    %cst_16 = arith.constant dense<0xFF800000> : vector<8xf32>
    %41 = vector.multi_reduction <maximumf>, %40, %cst_16 [1] : vector<8x8xf32> to vector<8xf32>
    %42 = vector.shape_cast %41 : vector<8xf32> to vector<8x1xf32>
    %43 = vector.broadcast %42 : vector<8x1xf32> to vector<8x8xf32>
    %44 = arith.subf %40, %43 : vector<8x8xf32>
    %45 = math.exp %44 : vector<8x8xf32>
    %cst_17 = arith.constant dense<0.000000e+00> : vector<8xf32>
    %46 = vector.multi_reduction <add>, %45, %cst_17 [1] : vector<8x8xf32> to vector<8xf32>
    %47 = vector.shape_cast %46 : vector<8xf32> to vector<8x1xf32>
    %48 = tpu.reciprocal %47 {approx = true} : vector<8x1xf32> -> vector<8x1xf32>
    %49 = vector.broadcast %48 : vector<8x1xf32> to vector<8x8xf32>
    %50 = arith.mulf %45, %49 : vector<8x8xf32>
    %51 = arith.truncf %50 : vector<8x8xf32> to vector<8x8xbf16>
    %52 = vector.extract_strided_slice %5 {offsets = [0, 8], sizes = [8, 8], strides = [1, 1]} : vector<8x32xbf16> to vector<8x8xbf16>
    "tpu.trace_start"() <{level = 10 : i32, message = "qk,kd->qd"}> : () -> ()
    %cst_18 = arith.constant dense<0.000000e+00> : vector<8x8xf32>
    %53 = tpu.matmul %51, %52, %cst_18 {dimension_numbers = #tpu.dot_dimension_numbers<[1], [0], [0], [1], [0, 0, 1, 1], [], []>} : vector<8x8xbf16>, vector<8x8xbf16>, vector<8x8xf32> -> vector<8x8xf32>
    "tpu.trace_stop"() : () -> ()
    %54 = vector.extract_strided_slice %1 {offsets = [0, 16], sizes = [8, 8], strides = [1, 1]} : vector<8x32xbf16> to vector<8x8xbf16>
    %55 = vector.extract_strided_slice %4 {offsets = [0, 16], sizes = [8, 8], strides = [1, 1]} : vector<8x32xbf16> to vector<8x8xbf16>
    "tpu.trace_start"() <{level = 10 : i32, message = "qd,kd->qk"}> : () -> ()
    %cst_19 = arith.constant dense<0.000000e+00> : vector<8x8xf32>
    %56 = tpu.matmul %54, %55, %cst_19 {dimension_numbers = #tpu.dot_dimension_numbers<[1], [1], [0], [0], [0, 0, 1, 0], [], []>} : vector<8x8xbf16>, vector<8x8xbf16>, vector<8x8xf32> -> vector<8x8xf32>
    "tpu.trace_stop"() : () -> ()
    %cst_20 = arith.constant 0.353553385 : f32
    %57 = vector.broadcast %cst_20 : f32 to vector<8x8xf32>
    %58 = arith.mulf %56, %57 : vector<8x8xf32>
    %cst_21 = arith.constant -1.000000e+09 : f32
    %59 = vector.shape_cast %9 : vector<1x8xi1> to vector<1x8xi1>
    %60 = vector.broadcast %59 : vector<1x8xi1> to vector<8x8xi1>
    %61 = vector.broadcast %cst_21 : f32 to vector<8x8xf32>
    %62 = arith.select %60, %61, %58 : vector<8x8xi1>, vector<8x8xf32>
    %cst_22 = arith.constant dense<0xFF800000> : vector<8xf32>
    %63 = vector.multi_reduction <maximumf>, %62, %cst_22 [1] : vector<8x8xf32> to vector<8xf32>
    %64 = vector.shape_cast %63 : vector<8xf32> to vector<8x1xf32>
    %65 = vector.broadcast %64 : vector<8x1xf32> to vector<8x8xf32>
    %66 = arith.subf %62, %65 : vector<8x8xf32>
    %67 = math.exp %66 : vector<8x8xf32>
    %cst_23 = arith.constant dense<0.000000e+00> : vector<8xf32>
    %68 = vector.multi_reduction <add>, %67, %cst_23 [1] : vector<8x8xf32> to vector<8xf32>
    %69 = vector.shape_cast %68 : vector<8xf32> to vector<8x1xf32>
    %70 = tpu.reciprocal %69 {approx = true} : vector<8x1xf32> -> vector<8x1xf32>
    %71 = vector.broadcast %70 : vector<8x1xf32> to vector<8x8xf32>
    %72 = arith.mulf %67, %71 : vector<8x8xf32>
    %73 = arith.truncf %72 : vector<8x8xf32> to vector<8x8xbf16>
    %74 = vector.extract_strided_slice %5 {offsets = [0, 16], sizes = [8, 8], strides = [1, 1]} : vector<8x32xbf16> to vector<8x8xbf16>
    "tpu.trace_start"() <{level = 10 : i32, message = "qk,kd->qd"}> : () -> ()
    %cst_24 = arith.constant dense<0.000000e+00> : vector<8x8xf32>
    %75 = tpu.matmul %73, %74, %cst_24 {dimension_numbers = #tpu.dot_dimension_numbers<[1], [0], [0], [1], [0, 0, 1, 1], [], []>} : vector<8x8xbf16>, vector<8x8xbf16>, vector<8x8xf32> -> vector<8x8xf32>
    "tpu.trace_stop"() : () -> ()
    %76 = vector.extract_strided_slice %1 {offsets = [0, 24], sizes = [8, 8], strides = [1, 1]} : vector<8x32xbf16> to vector<8x8xbf16>
    %77 = vector.extract_strided_slice %4 {offsets = [0, 24], sizes = [8, 8], strides = [1, 1]} : vector<8x32xbf16> to vector<8x8xbf16>
    "tpu.trace_start"() <{level = 10 : i32, message = "qd,kd->qk"}> : () -> ()
    %cst_25 = arith.constant dense<0.000000e+00> : vector<8x8xf32>
    %78 = tpu.matmul %76, %77, %cst_25 {dimension_numbers = #tpu.dot_dimension_numbers<[1], [1], [0], [0], [0, 0, 1, 0], [], []>} : vector<8x8xbf16>, vector<8x8xbf16>, vector<8x8xf32> -> vector<8x8xf32>
    "tpu.trace_stop"() : () -> ()
    %cst_26 = arith.constant 0.353553385 : f32
    %79 = vector.broadcast %cst_26 : f32 to vector<8x8xf32>
    %80 = arith.mulf %78, %79 : vector<8x8xf32>
    %cst_27 = arith.constant -1.000000e+09 : f32
    %81 = vector.shape_cast %9 : vector<1x8xi1> to vector<1x8xi1>
    %82 = vector.broadcast %81 : vector<1x8xi1> to vector<8x8xi1>
    %83 = vector.broadcast %cst_27 : f32 to vector<8x8xf32>
    %84 = arith.select %82, %83, %80 : vector<8x8xi1>, vector<8x8xf32>
    %cst_28 = arith.constant dense<0xFF800000> : vector<8xf32>
    %85 = vector.multi_reduction <maximumf>, %84, %cst_28 [1] : vector<8x8xf32> to vector<8xf32>
    %86 = vector.shape_cast %85 : vector<8xf32> to vector<8x1xf32>
    %87 = vector.broadcast %86 : vector<8x1xf32> to vector<8x8xf32>
    %88 = arith.subf %84, %87 : vector<8x8xf32>
    %89 = math.exp %88 : vector<8x8xf32>
    %cst_29 = arith.constant dense<0.000000e+00> : vector<8xf32>
    %90 = vector.multi_reduction <add>, %89, %cst_29 [1] : vector<8x8xf32> to vector<8xf32>
    %91 = vector.shape_cast %90 : vector<8xf32> to vector<8x1xf32>
    %92 = tpu.reciprocal %91 {approx = true} : vector<8x1xf32> -> vector<8x1xf32>
    %93 = vector.broadcast %92 : vector<8x1xf32> to vector<8x8xf32>
    %94 = arith.mulf %89, %93 : vector<8x8xf32>
    %95 = arith.truncf %94 : vector<8x8xf32> to vector<8x8xbf16>
    %96 = vector.extract_strided_slice %5 {offsets = [0, 24], sizes = [8, 8], strides = [1, 1]} : vector<8x32xbf16> to vector<8x8xbf16>
    "tpu.trace_start"() <{level = 10 : i32, message = "qk,kd->qd"}> : () -> ()
    %cst_30 = arith.constant dense<0.000000e+00> : vector<8x8xf32>
    %97 = tpu.matmul %95, %96, %cst_30 {dimension_numbers = #tpu.dot_dimension_numbers<[1], [0], [0], [1], [0, 0, 1, 1], [], []>} : vector<8x8xbf16>, vector<8x8xbf16>, vector<8x8xf32> -> vector<8x8xf32>
    "tpu.trace_stop"() : () -> ()
    %98 = tpu.concatenate %31, %53, %75, %97 in 1 : vector<8x8xf32>, vector<8x8xf32>, vector<8x8xf32>, vector<8x8xf32> -> vector<8x32xf32>
    %99 = arith.truncf %98 : vector<8x32xf32> to vector<8x32xbf16>
    %c0_31 = arith.constant 0 : index
    %c0_32 = arith.constant 0 : index
    %c0_33 = arith.constant 0 : index
    %100 = vector.load %arg4[%c0_31, %c0_32, %c0_33] : memref<1x8x32xbf16, #tpu.memory_space<vmem>>, vector<1x8x32xbf16>
    %101 = vector.shape_cast %100 : vector<1x8x32xbf16> to vector<8x32xbf16>
    %102 = vector.shape_cast %99 : vector<8x32xbf16> to vector<1x8x32xbf16>
    tpu.vector_store %arg4[%c0_31, %c0_32, %c0_33], %102 {strides = array<i32>} : memref<1x8x32xbf16, #tpu.memory_space<vmem>>, vector<1x8x32xbf16>,
    return
  }
  func.func @transform_0(%arg0: i32) -> (i32, i32, i32) {
    %c0_i32 = arith.constant 0 : i32
    %c0_i32_0 = arith.constant 0 : i32
    %c0_i32_1 = arith.constant 0 : i32
    return %arg0, %c0_i32, %c0_i32_0 : i32, i32, i32
  }
  func.func @transform_1(%arg0: i32) -> (i32, i32, i32) {
    %c0_i32 = arith.constant 0 : i32
    %c0_i32_0 = arith.constant 0 : i32
    %c0_i32_1 = arith.constant 0 : i32
    return %arg0, %c0_i32, %c0_i32_0 : i32, i32, i32
  }
  func.func @transform_2(%arg0: i32) -> (i32, i32, i32) {
    %c0_i32 = arith.constant 0 : i32
    %c0_i32_0 = arith.constant 0 : i32
    %c0_i32_1 = arith.constant 0 : i32
    return %arg0, %c0_i32, %c0_i32_0 : i32, i32, i32
  }
  func.func @transform_3(%arg0: i32) -> (i32, i32, i32) {
    %c0_i32 = arith.constant 0 : i32
    %c0_i32_0 = arith.constant 0 : i32
    %c0_i32_1 = arith.constant 0 : i32
    return %arg0, %c0_i32, %c0_i32_0 : i32, i32, i32
  }
}

module attributes {stable_mosaic.version = 11 : i64} {
  func.func @_ffn_add_norm_kernel(%arg0: i32, %arg1: memref<16x32xf32, #tpu.memory_space<vmem>>, %arg2: memref<32x64xbf16, #tpu.memory_space<vmem>>, %arg3: memref<1x64xf32, #tpu.memory_space<vmem>>, %arg4: memref<64x32xbf16, #tpu.memory_space<vmem>>, %arg5: memref<1x32xf32, #tpu.memory_space<vmem>>, %arg6: memref<1x32xf32, #tpu.memory_space<vmem>>, %arg7: memref<1x32xf32, #tpu.memory_space<vmem>>, %arg8: memref<16x32xf32, #tpu.memory_space<vmem>>) attributes {dimension_semantics = [#tpu.dimension_semantics<parallel>], iteration_bounds = array<i64: 1>, scalar_prefetch = 0 : i64, scratch_operands = 0 : i64, tpu.core_type = #tpu.core_type<tc>, window_params = [{transform_indices = @transform_0, window_bounds = array<i64: 16, 32>}, {pipeline_mode = #tpu.pipeline_mode<synchronous>, transform_indices = @transform_1, window_bounds = array<i64: 32, 64>}, {pipeline_mode = #tpu.pipeline_mode<synchronous>, transform_indices = @transform_2, window_bounds = array<i64: 1, 64>}, {pipeline_mode = #tpu.pipeline_mode<synchronous>, transform_indices = @transform_3, window_bounds = array<i64: 64, 32>}, {pipeline_mode = #tpu.pipeline_mode<synchronous>, transform_indices = @transform_4, window_bounds = array<i64: 1, 32>}, {pipeline_mode = #tpu.pipeline_mode<synchronous>, transform_indices = @transform_5, window_bounds = array<i64: 1, 32>}, {pipeline_mode = #tpu.pipeline_mode<synchronous>, transform_indices = @transform_6, window_bounds = array<i64: 1, 32>}, {transform_indices = @transform_7, window_bounds = array<i64: 16, 32>}]} {
    %c0 = arith.constant 0 : index
    %c0_0 = arith.constant 0 : index
    %0 = vector.load %arg1[%c0, %c0_0] : memref<16x32xf32, #tpu.memory_space<vmem>>, vector<16x32xf32>
    %1 = arith.truncf %0 : vector<16x32xf32> to vector<16x32xbf16>
    %c0_1 = arith.constant 0 : index
    %c0_2 = arith.constant 0 : index
    %2 = vector.load %arg2[%c0_1, %c0_2] : memref<32x64xbf16, #tpu.memory_space<vmem>>, vector<32x64xbf16>
    %cst = arith.constant dense<0.000000e+00> : vector<16x64xf32>
    %3 = tpu.matmul %1, %2, %cst {dimension_numbers = #tpu.dot_dimension_numbers<[1], [0], [0], [1], [0, 0, 1, 1], [], []>} : vector<16x32xbf16>, vector<32x64xbf16>, vector<16x64xf32> -> vector<16x64xf32>
    %c0_3 = arith.constant 0 : index
    %c0_4 = arith.constant 0 : index
    %4 = vector.load %arg3[%c0_3, %c0_4] : memref<1x64xf32, #tpu.memory_space<vmem>>, vector<1x64xf32>
    %5 = vector.broadcast %4 : vector<1x64xf32> to vector<16x64xf32>
    %6 = arith.addf %3, %5 : vector<16x64xf32>
    %cst_5 = arith.constant 0.000000e+00 : f32
    %7 = vector.broadcast %cst_5 : f32 to vector<16x64xf32>
    %8 = arith.maximumf %6, %7 : vector<16x64xf32>
    %9 = arith.truncf %8 : vector<16x64xf32> to vector<16x64xbf16>
    %c0_6 = arith.constant 0 : index
    %c0_7 = arith.constant 0 : index
    %10 = vector.load %arg4[%c0_6, %c0_7] : memref<64x32xbf16, #tpu.memory_space<vmem>>, vector<64x32xbf16>
    %cst_8 = arith.constant dense<0.000000e+00> : vector<16x32xf32>
    %11 = tpu.matmul %9, %10, %cst_8 {dimension_numbers = #tpu.dot_dimension_numbers<[1], [0], [0], [1], [0, 0, 1, 1], [], []>} : vector<16x64xbf16>, vector<64x32xbf16>, vector<16x32xf32> -> vector<16x32xf32>
    %c0_9 = arith.constant 0 : index
    %c0_10 = arith.constant 0 : index
    %12 = vector.load %arg5[%c0_9, %c0_10] : memref<1x32xf32, #tpu.memory_space<vmem>>, vector<1x32xf32>
    %13 = vector.broadcast %12 : vector<1x32xf32> to vector<16x32xf32>
    %14 = arith.addf %11, %13 : vector<16x32xf32>
    %c0_11 = arith.constant 0 : index
    %c0_12 = arith.constant 0 : index
    %15 = vector.load %arg6[%c0_11, %c0_12] : memref<1x32xf32, #tpu.memory_space<vmem>>, vector<1x32xf32>
    %c0_13 = arith.constant 0 : index
    %c0_14 = arith.constant 0 : index
    %16 = vector.load %arg7[%c0_13, %c0_14] : memref<1x32xf32, #tpu.memory_space<vmem>>, vector<1x32xf32>
    %cst_15 = arith.constant dense<0.000000e+00> : vector<16xf32>
    %17 = vector.multi_reduction <add>, %14, %cst_15 [1] : vector<16x32xf32> to vector<16xf32>
    %18 = vector.shape_cast %17 : vector<16xf32> to vector<16x1xf32>
    %cst_16 = arith.constant 3.200000e+01 : f32
    %19 = vector.broadcast %cst_16 : f32 to vector<16x1xf32>
    %20 = arith.divf %18, %19 : vector<16x1xf32>
    %21 = vector.broadcast %20 : vector<16x1xf32> to vector<16x32xf32>
    %22 = arith.subf %14, %21 : vector<16x32xf32>
    %23 = arith.mulf %22, %22 : vector<16x32xf32>
    %cst_17 = arith.constant dense<0.000000e+00> : vector<16xf32>
    %24 = vector.multi_reduction <add>, %23, %cst_17 [1] : vector<16x32xf32> to vector<16xf32>
    %25 = vector.shape_cast %24 : vector<16xf32> to vector<16x1xf32>
    %cst_18 = arith.constant 3.100000e+01 : f32
    %26 = vector.broadcast %cst_18 : f32 to vector<16x1xf32>
    %27 = arith.divf %25, %26 : vector<16x1xf32>
    %28 = math.sqrt %27 : vector<16x1xf32>
    %cst_19 = arith.constant 9.99999997E-7 : f32
    %29 = vector.broadcast %cst_19 : f32 to vector<16x1xf32>
    %30 = arith.addf %28, %29 : vector<16x1xf32>
    %31 = tpu.reciprocal %30 {approx = true} : vector<16x1xf32> -> vector<16x1xf32>
    %32 = vector.broadcast %15 : vector<1x32xf32> to vector<16x32xf32>
    %33 = arith.mulf %32, %22 : vector<16x32xf32>
    %34 = vector.broadcast %31 : vector<16x1xf32> to vector<16x32xf32>
    %35 = arith.mulf %33, %34 : vector<16x32xf32>
    %36 = vector.broadcast %16 : vector<1x32xf32> to vector<16x32xf32>
    %37 = arith.addf %35, %36 : vector<16x32xf32>
    %38 = arith.addf %0, %37 : vector<16x32xf32>
    %c0_20 = arith.constant 0 : index
    %c0_21 = arith.constant 0 : index
    %39 = vector.load %arg8[%c0_20, %c0_21] : memref<16x32xf32, #tpu.memory_space<vmem>>, vector<16x32xf32>
    tpu.vector_store %arg8[%c0_20, %c0_21], %38 {strides = array<i32>} : memref<16x32xf32, #tpu.memory_space<vmem>>, vector<16x32xf32>,
    return
  }
  func.func @transform_0(%arg0: i32) -> (i32, i32) {
    %c0_i32 = arith.constant 0 : i32
    %c0_i32_0 = arith.constant 0 : i32
    return %arg0, %c0_i32 : i32, i32
  }
  func.func @transform_1(%arg0: i32) -> (i32, i32) {
    %c0_i32 = arith.constant 0 : i32
    %c0_i32_0 = arith.constant 0 : i32
    %c0_i32_1 = arith.constant 0 : i32
    return %c0_i32, %c0_i32_0 : i32, i32
  }
  func.func @transform_2(%arg0: i32) -> (i32, i32) {
    %c0_i32 = arith.constant 0 : i32
    %c0_i32_0 = arith.constant 0 : i32
    %c0_i32_1 = arith.constant 0 : i32
    return %c0_i32, %c0_i32_0 : i32, i32
  }
  func.func @transform_3(%arg0: i32) -> (i32, i32) {
    %c0_i32 = arith.constant 0 : i32
    %c0_i32_0 = arith.constant 0 : i32
    %c0_i32_1 = arith.constant 0 : i32
    return %c0_i32, %c0_i32_0 : i32, i32
  }
  func.func @transform_4(%arg0: i32) -> (i32, i32) {
    %c0_i32 = arith.constant 0 : i32
    %c0_i32_0 = arith.constant 0 : i32
    %c0_i32_1 = arith.constant 0 : i32
    return %c0_i32, %c0_i32_0 : i32, i32
  }
  func.func @transform_5(%arg0: i32) -> (i32, i32) {
    %c0_i32 = arith.constant 0 : i32
    %c0_i32_0 = arith.constant 0 : i32
    %c0_i32_1 = arith.constant 0 : i32
    return %c0_i32, %c0_i32_0 : i32, i32
  }
  func.func @transform_6(%arg0: i32) -> (i32, i32) {
    %c0_i32 = arith.constant 0 : i32
    %c0_i32_0 = arith.constant 0 : i32
    %c0_i32_1 = arith.constant 0 : i32
    return %c0_i32, %c0_i32_0 : i32, i32
  }
  func.func @transform_7(%arg0: i32) -> (i32, i32) {
    %c0_i32 = arith.constant 0 : i32
    %c0_i32_0 = arith.constant 0 : i32
    return %arg0, %c0_i32 : i32, i32
  }
}

</mosaic_0001>

<bundles_post_ra>
// kernel: decoder_layer_forward.11
= control target key start
LH: loop header
LB: loop body
LE: loop exit
PB: predicated region body
PF: predicated region fallthrough
CT: control target
= control target key end

     0   :  { %8 = vsyncpa [#allocation3], 0  ;;  %s123_s15 = smov [#allocation2]   ;;  %s124_s17 = smov 64   ;;  %s164_s0 = inlined_call_operand.vmem [shape: f32[16,32], index: 0, kind: input, shape index: {}]   ;;  %s165_s1 = inlined_call_operand.hbm [shape: bf16[32,32], index: 1, kind: input, shape index: {}]   ;;  %s166_s2 = inlined_call_operand.vmem [shape: f32[1,32], index: 2, kind: input, shape index: {}]   ;;  %s167_s3 = inlined_call_operand.vmem [shape: bf16[16,32], index: 3, kind: output, shape index: {}]  }
   0x1   :  { %s15_s14 = sshll.u32 %s165_s1, 4  ;;  %s17_s16 = sshll.u32 %s123_s15, 4  ;;  %s16_s14 = int_to_ptr.hbm [resolvable:$true] %s15_s14  ;;  %s18_s16 = int_to_ptr.vmem [resolvable:$true] %s17_s16 }
   0x2   :  { %s125_s18 = smov 4  }
   0x3   :  { %23 = dma.hbm_to_vmem [thread:$0]  %s16_s14, 256, %s18_s16, [#allocation3], %s124_s17, %s124_s17, %s125_s18  }
   0x4   :  { %121 = dma.done.wait [#allocation3], 256  }
   0x5   :  { %122 = vsyncadd [#allocation3], 4294967040  ;;  %v92_v0 = vld [vmem:[#allocation2 + $0x8] sm:$0xff]  ;;  %v91_v1 = vld [vmem:[#allocation2] sm:$0xff]  ;;  %vm54_vm0 = vcmask 261120   ;;  %vm74_vm1 = vcmask 257024  }
   0x6   :  { %64 = vmatpush.bf16.msra.mxu0 %v92_v0  ;;  %v31_v2 = vld [vmem:[%s164_s0] sm:$0xff]  ;;  %v32_v3 = vld [vmem:[%s164_s0 + $0x8] sm:$0xff] }
   0x7   :  { %v33_v4 = vpack.c.bf16 %v32_v3, %v31_v2  ;;  %v96_v5 = vld [vmem:[%s166_s2] ss:$0 sm:$0xff] }
   0xa   :  { %65 = vmatpush.bf16.msra.mxu0 %v91_v1 }
   0xd   :  { %90 = vmatmul.msk.bf16.vlgmr.msra.gmra.mxu0 %vm54_vm0, %v33_v4 }
  0x8a   :  { %v67_v6 = vpop.f32.mrf.mxu0 }
  0x8b   :  { %v68_v7 = vadd.f32 %v96_v5, %v67_v6 }
  0x8d   :  { %v72_v8 = vpack.c.bf16 %v68_v7, %v68_v7 }
  0x8f   :  { %75 = vst.msk [vmem:[%s167_s3] sm:$0xf] %vm74_vm1, %v72_v8 }
  0x92   :  { %v69_v9 = vpop.f32.mrf.mxu0 }
  0x93   :  { %v70_v10 = vadd.f32 %v96_v5, %v69_v9 }
  0x95   :  { %v73_v11 = vpack.c.bf16 %v70_v10, %v70_v10 }
  0x97   :  { %76 = vst.msk [vmem:[%s167_s3 + $0x4] sm:$0xf] %vm74_vm1, %v73_v11 }
  0x98   :  { %81 = vsyncpa [#allocation3], 1 }

// kernel: decoder_layer_forward.8
= control target key start
LH: loop header
LB: loop body
LE: loop exit
PB: predicated region body
PF: predicated region fallthrough
CT: control target
= control target key end

     0   :  { %8 = vsyncpa [#allocation3], 0  ;;  %s207_s0 = inlined_call_operand.hbm [shape: f32[16,32], index: 0, kind: input, shape index: {}]   ;;  %s208_s1 = inlined_call_operand.vmem [shape: bf16[32,96], index: 1, kind: input, shape index: {}]   ;;  %s209_s2 = inlined_call_operand.hbm [shape: f32[1,96], index: 2, kind: input, shape index: {}]   ;;  %s210_s3 = inlined_call_operand.vmem [shape: bf16[16,96], index: 3, kind: output, shape index: {}]  }
   0x1   :  { %s14_s14 = sshll.u32 %s207_s0, 4  ;;  %s15_s14 = int_to_ptr.hbm [resolvable:$true] %s14_s14 }
   0x2   :  { %9 = vsyncpa [#allocation5], 0  ;;  %s165_s15 = smov [#allocation2]   ;;  %s30_s19 = sshll.u32 %s209_s2, 4  ;;  %s31_s19 = int_to_ptr.hbm [resolvable:$true] %s30_s19 }
   0x3   :  { %s16_s16 = sshll.u32 %s165_s15, 4  ;;  %s166_s20 = smov 128   ;;  %s17_s16 = int_to_ptr.vmem [resolvable:$true] %s16_s16 }
   0x4   :  { %s167_s21 = smov 8   ;;  %s168_s22 = smov [#allocation4]  }
   0x5   :  { %22 = dma.hbm_to_vmem [thread:$0]  %s15_s14, 256, %s17_s16, [#allocation3], %s166_s20, %s166_s20, %s167_s21  }
   0x6   :  { %s32_s23 = sshll.u32 %s168_s22, 4  ;;  %s33_s23 = int_to_ptr.vmem [resolvable:$true] %s32_s23 }
   0x7   :  { %35 = dma.hbm_to_vmem [thread:$0]  %s31_s19, 16, %s33_s23, [#allocation5]  }
   0x8   :  { %161 = dma.done.wait [#allocation3], 256  }
   0x9   :  { %162 = vsyncadd [#allocation3], 4294967040 }
   0xa   :  { %163 = dma.done.wait [#allocation5], 16  }
   0xb   :  { %164 = vsyncadd [#allocation5], 4294967280  ;;  %v107_v0 = vld [vmem:[%s208_s1 + $0x8] sm:$0xff]  ;;  %v106_v1 = vld [vmem:[%s208_s1] sm:$0xff]  ;;  %vm68_vm0 = vcmask 261120   ;;  %vm88_vm1 = vcmask 781312  }
   0xc   :  { %78 = vmatpush.bf16.msra.mxu0 %v107_v0  ;;  %v45_v2 = vld [vmem:[#allocation2] sm:$0xff]  ;;  %v46_v3 = vld [vmem:[#allocation2 + $0x8] sm:$0xff]  ;;  %v112_v5 = vld [vmem:[#allocation4] ss:$0 sm:$0xff] }
   0xd   :  { %v47_v4 = vpack.c.bf16 %v46_v3, %v45_v2 }
  0x10   :  { %79 = vmatpush.bf16.msra.mxu0 %v106_v1 }
  0x13   :  { %105 = vmatmul.msk.bf16.vlgmr.msra.gmra.mxu0 %vm68_vm0, %v47_v4 }
  0x90   :  { %v81_v6 = vpop.f32.mrf.mxu0 }
  0x91   :  { %v82_v7 = vadd.f32 %v112_v5, %v81_v6 }
  0x93   :  { %v86_v8 = vpack.c.bf16 %v82_v7, %v82_v7 }
  0x95   :  { %89 = vst.msk [vmem:[%s210_s3] sm:$0xf] %vm88_vm1, %v86_v8 }
  0x98   :  { %v83_v9 = vpop.f32.mrf.mxu0 }
  0x99   :  { %v84_v10 = vadd.f32 %v112_v5, %v83_v9 }
  0x9b   :  { %v87_v11 = vpack.c.bf16 %v84_v10, %v84_v10 }
  0x9d   :  { %90 = vst.msk [vmem:[%s210_s3 + $0x4] sm:$0xf] %vm88_vm1, %v87_v11 }
  0x9e   :  { %95 = vsyncpa [#allocation3], 1 }
  0x9f   :  { %96 = vsyncpa [#allocation5], 1 }

// kernel: decoder_layer_forward.10
= control target key start
LH: loop header
LB: loop body
LE: loop exit
PB: predicated region body
PF: predicated region fallthrough
CT: control target
= control target key end

     0   :  { %11 = vsyncpa [#allocation3], 0  ;;  %s387_s0 = inlined_call_operand.vmem [shape: bf16[16,32], index: 0, kind: input, shape index: {}]   ;;  %s388_s1 = inlined_call_operand.vmem [shape: f32[16,32], index: 1, kind: input, shape index: {}]   ;;  %s389_s2 = inlined_call_operand.vmem [shape: bf16[32,32], index: 2, kind: input, shape index: {}]   ;;  %s390_s3 = inlined_call_operand.hbm [shape: f32[1,32], index: 3, kind: input, shape index: {}]   ;;  %s391_s4 = inlined_call_operand.hbm [shape: f32[1,32], index: 4, kind: input, shape index: {}]   ;;  %s392_s5 = inlined_call_operand.hbm [shape: f32[1,32], index: 5, kind: input, shape index: {}]   ;;  %s393_s6 = inlined_call_operand.vmem [shape: f32[16,32], index: 6, kind: output, shape index: {}]  }
   0x1   :  { %12 = vsyncpa [#allocation5], 0  ;;  %s35_s23 = sshll.u32 %s391_s4, 4  ;;  %s310_s24 = smov [#allocation4]   ;;  %s36_s23 = int_to_ptr.hbm [resolvable:$true] %s35_s23 }
   0x2   :  { %s37_s25 = sshll.u32 %s310_s24, 4  ;;  %s24_s28 = sshll.u32 %s390_s3, 4  ;;  %s38_s25 = int_to_ptr.vmem [resolvable:$true] %s37_s25  ;;  %s25_s28 = int_to_ptr.hbm [resolvable:$true] %s24_s28 }
   0x3   :  { %40 = dma.hbm_to_vmem [thread:$0]  %s36_s23, 16, %s38_s25, [#allocation5]  }
   0x4   :  { %s311_s29 = smov [#allocation2]   ;;  %s46_s9 = sshll.u32 %s392_s5, 4  ;;  %s47_s9 = int_to_ptr.hbm [resolvable:$true] %s46_s9 }
   0x5   :  { %s26_s30 = sshll.u32 %s311_s29, 4  ;;  %s312_s4 = smov [#allocation6]   ;;  %s27_s30 = int_to_ptr.vmem [resolvable:$true] %s26_s30 }
   0x6   :  { %29 = dma.hbm_to_vmem [thread:$0]  %s25_s28, 16, %s27_s30, [#allocation3]  }
   0x7   :  { %s48_s10 = sshll.u32 %s312_s4, 4  ;;  %s49_s10 = int_to_ptr.vmem [resolvable:$true] %s48_s10 }
   0x8   :  { %51 = dma.hbm_to_vmem [thread:$0]  %s47_s9, 16, %s49_s10, [#allocation5]  }
   0x9   :  { %306 = dma.done.wait [#allocation3], 16  }
   0xa   :  { %307 = vsyncadd [#allocation3], 4294967280 }
   0xb   :  { %308 = dma.done.wait [#allocation5], 32  }
   0xc   :  { %309 = vsyncadd [#allocation5], 4294967264  ;;  %v213_v0 = vld [vmem:[%s389_s2 + $0x8] sm:$0xff]  ;;  %v212_v1 = vld [vmem:[%s389_s2] sm:$0xff]  ;;  %vm92_vm0 = vcmask 261120   ;;  %v313_v10 = vmov 32.0  }
   0xd   :  { %102 = vmatpush.bf16.msra.mxu0 %v213_v0  ;;  %v211_v2 = vld [vmem:[%s387_s0] sm:$0xff]  ;;  %222 = vrcp.f32 %v313_v10  ;;  %v314_v27 = vmov 31.0  }
   0xe   :  { %v219_v3 = vld [vmem:[#allocation2] ss:$0 sm:$0xff]  ;;  %224 = vrcp.f32 %v314_v27  ;;  %v220_v55 = vld [vmem:[#allocation4] ss:$0 sm:$0xff]  ;;  %v221_v60 = vld [vmem:[#allocation6] ss:$0 sm:$0xff] }
  0x11   :  { %103 = vmatpush.bf16.msra.mxu0 %v212_v1  ;;  %v186_v1 = vld [vmem:[%s388_s1] sm:$0xff] }
  0x13   :  { %v223_v11 = vpop.eup %222 }
  0x14   :  { %210 = vmatmul.msk.bf16.vlgmr.msra.gmra.mxu0 %vm92_vm0, %v211_v2  ;;  %v119_v12 = vmul.f32 32.0, %v223_v11  ;;  %vm123_vm1 = vweird.f32 %v223_v11  ;;  %v225_v28 = vpop.eup %224 }
  0x15   :  { %v138_v29 = vmul.f32 31.0, %v225_v28  ;;  %vm142_vm2 = vweird.f32 %v225_v28 }
  0x16   :  { %v120_v13 = vsub.f32 1.0, %v119_v12 }
  0x17   :  { %v139_v30 = vsub.f32 1.0, %v138_v29 }
  0x18   :  { %v121_v14 = vmul.f32 %v223_v11, %v120_v13 }
  0x19   :  { %v140_v31 = vmul.f32 %v225_v28, %v139_v30 }
  0x1a   :  { %v122_v15 = vadd.f32 %v223_v11, %v121_v14 }
  0x1b   :  { %v141_v32 = vadd.f32 %v225_v28, %v140_v31 }
  0x1c   :  { %v124_v16 = vsel %vm123_vm1, %v223_v11, %v122_v15 }
  0x1d   :  { %v143_v33 = vsel %vm142_vm2, %v225_v28, %v141_v32 }
  0x91   :  { %v105_v4 = vpop.f32.mrf.mxu0 }
  0x92   :  { %v106_v5 = vadd.f32 %v219_v3, %v105_v4 }
  0x94   :  { %v112_v6 = vsel %vm92_vm0, %v106_v5, 0.0 }
  0x95   :  { %113 = vadd.xlane.f32.xlu0 %v112_v6 }
  0x99   :  { %v107_v7 = vpop.f32.mrf.mxu0 }
  0x9a   :  { %v108_v8 = vadd.f32 %v219_v3, %v107_v7  ;;  %v187_v7 = vld [vmem:[%s388_s1 + $0x8] sm:$0xff] }
  0x9c   :  { %v115_v9 = vsel %vm92_vm0, %v108_v8, 0.0 }
  0x9d   :  { %116 = vadd.xlane.f32.xlu0 %v115_v9 }
 0x108   :  { %v114_v17 = vpop.xlane.xlu0 %113 }
 0x109   :  { %v125_v18 = vmul.f32 %v124_v16, %v114_v17 }
 0x10b   :  { %v127_v19 = vsub.f32 %v106_v5, %v125_v18 }
 0x10d   :  { %v129_v20 = vmul.f32 %v127_v19, %v127_v19  ;;  %v177_v59 = vmul.f32 %v220_v55, %v127_v19 }
 0x10f   :  { %v131_v21 = vsel %vm92_vm0, %v129_v20, 0.0 }
 0x110   :  { %132 = vadd.xlane.f32.xlu1 %v131_v21  ;;  %v117_v22 = vpop.xlane.xlu0 %116 }
 0x111   :  { %v126_v23 = vmul.f32 %v124_v16, %v117_v22 }
 0x113   :  { %v128_v24 = vsub.f32 %v108_v8, %v126_v23 }
 0x115   :  { %v130_v25 = vmul.f32 %v128_v24, %v128_v24  ;;  %v178_v4 = vmul.f32 %v220_v55, %v128_v24 }
 0x117   :  { %v134_v26 = vsel %vm92_vm0, %v130_v25, 0.0 }
 0x118   :  { %135 = vadd.xlane.f32.xlu1 %v134_v26 }
 0x183   :  { %v133_v34 = vpop.xlane.xlu1 %132 }
 0x184   :  { %v144_v35 = vmul.f32 %v143_v33, %v133_v34 }
 0x186   :  { %226 = vrsqrt.f32 %v144_v35  ;;  %vm153_vm3 = vcmp.eq.f32.partialorder %v144_v35, inf  ;;  %v156_v48 = vand.u32 2147483648, %v144_v35  ;;  %vm155_vm4 = vcmp.eq.f32.partialorder %v144_v35, 0.0 }
 0x18b   :  { %v136_v36 = vpop.xlane.xlu1 %135 }
 0x18c   :  { %v227_v37 = vpop.eup %226  ;;  %v145_v38 = vmul.f32 %v143_v33, %v136_v36 }
 0x18d   :  { %v147_v39 = vmul.f32 %v227_v37, %v144_v35 }
 0x18e   :  { %228 = vrsqrt.f32 %v145_v38  ;;  %vm165_vm5 = vcmp.eq.f32.partialorder %v145_v38, inf  ;;  %v168_v57 = vand.u32 2147483648, %v145_v38  ;;  %vm167_vm6 = vcmp.eq.f32.partialorder %v145_v38, 0.0 }
 0x18f   :  { %v148_v40 = vmul.f32 %v227_v37, %v147_v39 }
 0x191   :  { %v149_v41 = vmul.f32 0.5, %v148_v40 }
 0x193   :  { %v150_v42 = vsub.f32 1.5, %v149_v41 }
 0x194   :  { %v229_v43 = vpop.eup %228 }
 0x195   :  { %v151_v44 = vmul.f32 %v227_v37, %v150_v42  ;;  %v159_v45 = vmul.f32 %v229_v43, %v145_v38 }
 0x197   :  { %v152_v46 = vmul.f32 %v151_v44, %v144_v35  ;;  %v160_v47 = vmul.f32 %v229_v43, %v159_v45 }
 0x199   :  { %v154_v49 = vsel %vm153_vm3, %v144_v35, %v152_v46  ;;  %v161_v50 = vmul.f32 0.5, %v160_v47 }
 0x19a   :  { %v157_v51 = vsel %vm155_vm4, %v156_v48, %v154_v49 }
 0x19b   :  { %v170_v52 = vadd.f32 1e-06, %v157_v51  ;;  %v162_v53 = vsub.f32 1.5, %v161_v50 }
 0x19d   :  { %230 = vrcp.f32 %v170_v52  ;;  %v163_v54 = vmul.f32 %v229_v43, %v162_v53 }
 0x19f   :  { %v164_v56 = vmul.f32 %v163_v54, %v145_v38 }
 0x1a1   :  { %v166_v58 = vsel %vm165_vm5, %v145_v38, %v164_v56 }
 0x1a2   :  { %v169_v61 = vsel %vm167_vm6, %v168_v57, %v166_v58 }
 0x1a3   :  { %v231_v62 = vpop.eup %230  ;;  %v171_v63 = vadd.f32 1e-06, %v169_v61 }
 0x1a4   :  { %v179_v0 = vmul.f32 %v231_v62, %v177_v59 }
 0x1a5   :  { %232 = vrcp.f32 %v171_v63 }
 0x1a6   :  { %v184_v2 = vadd.f32 %v221_v60, %v179_v0 }
 0x1a8   :  { %v188_v3 = vadd.f32 %v186_v1, %v184_v2 }
 0x1aa   :  { %190 = vst.msk [vmem:[%s393_s6] sm:$0xff] %vm92_vm0, %v188_v3 }
 0x1ab   :  { %v233_v5 = vpop.eup %232 }
 0x1ac   :  { %v180_v6 = vmul.f32 %v233_v5, %v178_v4 }
 0x1ae   :  { %v185_v8 = vadd.f32 %v221_v60, %v180_v6 }
 0x1b0   :  { %v189_v9 = vadd.f32 %v187_v7, %v185_v8 }
 0x1b2   :  { %191 = vst.msk [vmem:[%s393_s6 + $0x8] sm:$0xff] %vm92_vm0, %v189_v9 }
 0x1b3   :  { %196 = vsyncpa [#allocation3], 1 }
 0x1b4   :  { %197 = vsyncpa [#allocation5], 1 }

// kernel: decoder_layer_forward.9
= control target key start
LH: loop header
LB: loop body
LE: loop exit
PB: predicated region body
PF: predicated region fallthrough
CT: control target
= control target key end

     0   :  { %s573_s9 = smov 0   ;;  %s646_s0 = inlined_call_operand.vmem [shape: s32[2,8,8], index: 0, kind: input, shape index: {}]   ;;  %s647_s1 = inlined_call_operand.vmem [shape: bf16[2,8,96], index: 1, kind: input, shape index: {}]   ;;  %s648_s2 = inlined_call_operand.vmem [shape: bf16[2,8,32], index: 2, kind: output, shape index: {}]  }
   0x1 LB: > { %s480_s10 = sadd.s32 4294967295, %s542_s9   ;;  %p484_p0 = scmp.ge.s32.totalorder %s542_s9, 1  ;;  %s542_s9 = sphi %s573_s9, %s12_s9  }
   0x2   : > { %p120_p1 = scmp.lt.s32.totalorder %s542_s9, 3 }
   0x4   : > { %p121_p2 = pnand %p484_p0, %p120_p1 }
   0x5   : > { %p144_p3 = scmp.lt.s32.totalorder (!%p121_p2), %s480_s10, 1  ;;  %s544_s15 = smov (!%p121_p2), 96  }
   0x6   : > { %124 = sbr.rel (%p121_p2) target bundleno = 1199 (0x4af), region = 28  ;;  %s545_s16 = smov (!%p121_p2), 88  }
   0x7   : > { %s546_s17 = smov (!%p121_p2), 120   ;;  %s547_s18 = smov (!%p121_p2), 64  }
   0x8   : > { %s548_s19 = smov (!%p121_p2), 80   ;;  %s549_s20 = smov (!%p121_p2), 72  }
   0x9   : > { %s550_s21 = smov (!%p121_p2), 112   ;;  %s551_s22 = smov (!%p121_p2), 104  }
   0xa   : > { %s552_s27 = smov (!%p121_p2), 56   ;;  %s553_s28 = smov (!%p121_p2), 40  }
   0xb   : > { %s650_s10 = smov (!%p144_p3, %s480_s10), 1  ;;  %vm165_vm0 = vcmask 64512   ;;  %vm204_vm2 = vcmask 1043456   ;;  %s554_s29 = smov 48   ;;  %vm408_vm3 = vcmask 130048   ;;  %vm410_vm4 = vcmask 195584  }
   0xc   : > { %s486_s11 = sshll.u32 %s650_s10, 2  ;;  %s485_s23 = sshll.u32 %s650_s10, 3  ;;  %vm413_vm5 = vcmask 257024  }
   0xd   : > { %s151_s14 = scalar_lea.vmem %s647_s1, %s486_s11  ;;  %s147_s26 = scalar_lea.vmem %s646_s0, %s485_s23 }
   0xe   : > { %v157_v0 = vld [vmem:[%s151_s14] sm:$0xf]  ;;  %s555_s30 = smov 8   ;;  %s556_s3 = smov 16  }
   0xf   : > { %v161_v1 = vunpack.c.l.b16 %v157_v0  ;;  %v158_v8 = vld [vmem:[%s147_s26] sm:$0xff]  ;;  %s557_s4 = smov 24   ;;  %s155_s7 = scalar_lea.vmem %s648_s2, %s486_s11 }
  0x10   : > { %vm159_vm1 = vcmp.eq.s32.totalorder %v158_v8, 0 }
  0x11   : > { %v589_v2 = vpack.c.b16 %v161_v1, %v161_v1 }
  0x13   : > { %163 = vrot.lane.b32.xlu0 %v589_v2, %s544_s15  ;;  %223 = vrot.lane.b32.xlu1 %v589_v2, %s545_s16 }
  0x14   : > { %221 = vrot.lane.b32.xlu2 %v589_v2, %s546_s17 }
  0x1c   : > { %199 = vrot.lane.b32.xlu2 %v589_v2, %s547_s18 }
  0x24   : > { %281 = vrot.lane.b32.xlu2 %v589_v2, %s548_s19 }
  0x2c   : > { %339 = vrot.lane.b32.xlu2 %v589_v2, %s549_s20 }
  0x34   : > { %279 = vrot.lane.b32.xlu2 %v589_v2, %s550_s21 }
  0x3c   : > { %337 = vrot.lane.b32.xlu2 %v589_v2, %s551_s22 }
  0x6e   : > { %v222_v7 = vpop.permute.xlu2 %221 }
  0x76   : > { %v200_v14 = vpop.permute.xlu2 %199 }
  0x77   : > { %v206_v19 = vsel %vm204_vm2, %v200_v14, 0 }
  0x78   : > { %215 = vmatpush.bf16.msra.mxu1 %v206_v19 }
  0x7e   : > { %v282_v15 = vpop.permute.xlu2 %281 }
  0x7f   : > { %v287_v17 = vsel %vm165_vm0, %v282_v15, 0 }
  0x80   : > { %296 = vmatpush.bf16.xpose.msrb.mxu1 %v287_v17 }
  0x85   : > { %v164_v3 = vpop.permute.xlu0 %163  ;;  %v224_v5 = vpop.permute.xlu1 %223 }
  0x86   : > { %v170_v4 = vsel %vm165_vm0, %v164_v3, 0  ;;  %v229_v6 = vsel %vm165_vm0, %v224_v5, 0  ;;  %v340_v16 = vpop.permute.xlu2 %339 }
  0x87   : > { %179 = vmatpush.bf16.xpose.msra.mxu0 %v170_v4  ;;  %238 = vmatpush.bf16.xpose.msra.mxu2 %v229_v6  ;;  %v345_v18 = vsel %vm165_vm0, %v340_v16, 0 }
  0x8e   : > { %488 = vmatmul.msk.bf16.vlgmr.msra.gmra.mxu0 %vm165_vm0, %v157_v0  ;;  %490 = vmatmul.msk.bf16.vlgmr.msra.gmra.mxu2 %vm165_vm0, %v222_v7  ;;  %v280_v20 = vpop.permute.xlu2 %279 }
  0x8f   : > { %354 = vmatpush.bf16.xpose.msrb.mxu0 %v345_v18 }
  0x96   : > { %v338_v22 = vpop.permute.xlu2 %337 }
  0x9e   : > { %494 = vmatmul.msk.bf16.vlgmr.msrb.gmra.mxu0 %vm165_vm0, %v338_v22 }
 0x10b   : > { %v181_v9 = vpop.f32.mrf.mxu0 }
 0x10c   : > { %v185_v10 = vmul.f32 0.35355338, %v181_v9 }
 0x10e   : > { %v186_v11 = vsel %vm159_vm1, -1e+09, %v185_v10 }
 0x10f   : > { %v187_v12 = vsel %vm165_vm0, %v186_v11, -inf }
 0x110   : > { %188 = vmax.xlane.f32.xlu0 %v187_v12 }
 0x111   : > { %v240_v21 = vpop.f32.mrf.mxu2 }
 0x112   : > { %v244_v23 = vmul.f32 0.35355338, %v240_v21 }
 0x113   : > { %v183_v13 = vpop.f32.mrf.mxu0 }
 0x114   : > { %v245_v24 = vsel %vm159_vm1, -1e+09, %v244_v23 }
 0x115   : > { %v246_v26 = vsel %vm165_vm0, %v245_v24, -inf }
 0x116   : > { %247 = vmax.xlane.f32.xlu2 %v246_v26 }
 0x119   : > { %v242_v29 = vpop.f32.mrf.mxu2 }
 0x11b   : > { %v356_v32 = vpop.f32.mrf.mxu0 }
 0x11c   : > { %v360_v33 = vmul.f32 0.35355338, %v356_v32 }
 0x11e   : > { %v361_v34 = vsel %vm159_vm1, -1e+09, %v360_v33 }
 0x11f   : > { %v362_v36 = vsel %vm165_vm0, %v361_v34, -inf }
 0x123   : > { %v358_v37 = vpop.f32.mrf.mxu0 }
 0x183   : > { %v189_v25 = vpop.xlane.xlu0 %188 }
 0x184   : > { %v190_v27 = vsub.f32 %v186_v11, %v189_v25 }
 0x186   : > { %v191_v28 = vmul.f32 1.442695, %v190_v27 }
 0x188   : > { %520 = vpow2.f32 %v191_v28 }
 0x189   : > { %v248_v42 = vpop.xlane.xlu2 %247 }
 0x18a   : > { %v249_v44 = vsub.f32 %v245_v24, %v248_v42 }
 0x18c   : > { %v250_v45 = vmul.f32 1.442695, %v249_v44 }
 0x18e   : > { %v521_v30 = vpop.eup %520 }
 0x18f   : > { %v193_v31 = vsel %vm165_vm0, %v521_v30, 0.0 }
 0x190   : > { %194 = vadd.xlane.f32.xlu1 %v193_v31 }
 0x198   : > { %363 = vmax.xlane.f32.xlu1 %v362_v36 }
 0x1b1   : > { %258 = vrot.lane.b32.xlu1 %v589_v2, %s552_s27 }
 0x1b9   : > { %374 = vrot.lane.b32.xlu1 %v589_v2, %s553_s28 }
 0x203   : > { %v195_v35 = vpop.xlane.xlu1 %194 }
 0x204   : > { %522 = vrcp.f32 %v195_v35 }
 0x205   : > { %524 = vpow2.f32 %v250_v45 }
 0x20a   : > { %v523_v38 = vpop.eup %522 }
 0x20b   : > { %v197_v39 = vmul.f32 %v523_v38, %v521_v30  ;;  %v364_v46 = vpop.xlane.xlu1 %363  ;;  %v525_v54 = vpop.eup %524 }
 0x20c   : > { %v365_v49 = vsub.f32 %v361_v34, %v364_v46  ;;  %v252_v55 = vsel %vm165_vm0, %v525_v54, 0.0 }
 0x20d   : > { %v198_v40 = vpack.c.bf16 %v197_v39, %v197_v39 }
 0x20e   : > { %v366_v52 = vmul.f32 1.442695, %v365_v49 }
 0x20f   : > { %489 = vmatmul.msk.bf16.vlgmr.msra.gmra.mxu1 %vm165_vm0, %v198_v40 }
 0x210   : > { %526 = vpow2.f32 %v366_v52 }
 0x216   : > { %v527_v56 = vpop.eup %526 }
 0x217   : > { %v368_v57 = vsel %vm165_vm0, %v527_v56, 0.0 }
 0x21f   : > { %492 = vmatmul.msk.bf16.vlgmr.msrb.gmra.mxu1 %vm165_vm0, %v280_v20 }
 0x223   : > { %v259_v58 = vpop.permute.xlu1 %258 }
 0x224   : > { %v264_v59 = vsel %vm204_vm2, %v259_v58, 0 }
 0x225   : > { %273 = vmatpush.bf16.msra.mxu3 %v264_v59 }
 0x22b   : > { %v375_v60 = vpop.permute.xlu1 %374 }
 0x22c   : > { %v380_v61 = vsel %vm204_vm2, %v375_v60, 0 }
 0x22d   : > { %389 = vmatpush.bf16.msrb.mxu2 %v380_v61 }
 0x28c   : > { %v622_v41 = vpop.f32.mrf.mxu1 }
 0x294   : > { %v219_v43 = vpop.f32.mrf.mxu1 }
 0x29c   : > { %v298_v47 = vpop.f32.mrf.mxu1 }
 0x29d   : > { %v302_v48 = vmul.f32 0.35355338, %v298_v47 }
 0x29f   : > { %v303_v50 = vsel %vm159_vm1, -1e+09, %v302_v48 }
 0x2a0   : > { %v304_v51 = vsel %vm165_vm0, %v303_v50, -inf }
 0x2a1   : > { %305 = vmax.xlane.f32.xlu0 %v304_v51 }
 0x2a4   : > { %v300_v53 = vpop.f32.mrf.mxu1 }
 0x2a9   : > { %253 = vadd.xlane.f32.xlu0 %v252_v55 }
 0x2b1   : > { %369 = vadd.xlane.f32.xlu0 %v368_v57 }
 0x314   : > { %v306_v62 = vpop.xlane.xlu0 %305 }
 0x315   : > { %v307_v63 = vsub.f32 %v303_v50, %v306_v62 }
 0x317   : > { %v308_v0 = vmul.f32 1.442695, %v307_v63 }
 0x319   : > { %528 = vpow2.f32 %v308_v0 }
 0x31c   : > { %v254_v1 = vpop.xlane.xlu0 %253 }
 0x31d   : > { %530 = vrcp.f32 %v254_v1 }
 0x31f   : > { %v529_v3 = vpop.eup %528 }
 0x320   : > { %v310_v4 = vsel %vm165_vm0, %v529_v3, 0.0 }
 0x321   : > { %311 = vadd.xlane.f32.xlu0 %v310_v4 }
 0x323   : > { %v531_v5 = vpop.eup %530 }
 0x324   : > { %v370_v6 = vpop.xlane.xlu0 %369  ;;  %v256_v7 = vmul.f32 %v531_v5, %v525_v54 }
 0x325   : > { %532 = vrcp.f32 %v370_v6 }
 0x326   : > { %v257_v8 = vpack.c.bf16 %v256_v7, %v256_v7 }
 0x328   : > { %491 = vmatmul.msk.bf16.vlgmr.msra.gmra.mxu3 %vm165_vm0, %v257_v8 }
 0x32b   : > { %v533_v9 = vpop.eup %532 }
 0x32c   : > { %v372_v10 = vmul.f32 %v533_v9, %v527_v56 }
 0x32e   : > { %v373_v11 = vpack.c.bf16 %v372_v10, %v372_v10 }
 0x330   : > { %495 = vmatmul.msk.bf16.vlgmr.msrb.gmra.mxu2 %vm165_vm0, %v373_v11 }
 0x335   : > { %316 = vrot.lane.b32.xlu0 %v589_v2, %s554_s29 }
 0x394   : > { %v312_v12 = vpop.xlane.xlu0 %311 }
 0x395   : > { %534 = vrcp.f32 %v312_v12 }
 0x39b   : > { %v535_v13 = vpop.eup %534 }
 0x39c   : > { %v314_v14 = vmul.f32 %v535_v13, %v529_v3 }
 0x39e   : > { %v315_v17 = vpack.c.bf16 %v314_v14, %v314_v14 }
 0x3a7   : > { %v317_v15 = vpop.permute.xlu0 %316 }
 0x3a8   : > { %v322_v16 = vsel %vm204_vm2, %v317_v15, 0 }
 0x3a9   : > { %331 = vmatpush.bf16.msrb.mxu3 %v322_v16 }
 0x3ab   : > { %v275_v18 = vpop.f32.mrf.mxu3 }
 0x3ac   : > { %493 = vmatmul.msk.bf16.vlgmr.msrb.gmra.mxu3 %vm165_vm0, %v315_v17  ;;  %396 = vrot.lane.b32.xlu2 %v275_v18, %s555_s30 }
 0x3b3   : > { %v277_v19 = vpop.f32.mrf.mxu3  ;;  %v391_v20 = vpop.f32.mrf.mxu2 }
 0x3bb   : > { %v393_v21 = vpop.f32.mrf.mxu2 }
 0x406   : > { %v397_v24 = vpop.permute.xlu2 %396 }
 0x407   : > { %v407_v25 = vsel %vm165_vm0, %v622_v41, %v397_v24 }
 0x42f   : > { %v333_v22 = vpop.f32.mrf.mxu3 }
 0x430   : > { %400 = vrot.lane.b32.xlu1 %v333_v22, %s556_s3 }
 0x437   : > { %v335_v2 = vpop.f32.mrf.mxu3 }
 0x438   : > { %404 = vrot.lane.b32.xlu1 %v391_v20, %s557_s4 }
 0x4a2   : > { %v401_v23 = vpop.permute.xlu1 %400 }
 0x4a3   : > { %v409_v26 = vsel %vm408_vm3, %v407_v25, %v401_v23 }
 0x4aa   : > { %v405_v27 = vpop.permute.xlu1 %404 }
 0x4ab   : > { %v411_v28 = vsel %vm410_vm4, %v409_v26, %v405_v27 }
 0x4ac   : > { %v412_v29 = vpack.c.bf16 %v411_v28, %v411_v28 }
 0x4ae   : > { %414 = vst.msk [vmem:[%s155_s7] sm:$0xf] %vm413_vm5, %v412_v29 }
 0x4af PF: > { %s12_s9 = sadd.s32 1, %s542_s9  }
 0x4b0   : > { %p9_p4 = scmp.ge.s32.totalorder %s12_s9, 4  }
 0x4b2   :  { %11 = sbr.rel (!%p9_p4) target bundleno = 1 (0x1), region = 61 }

// kernel: decoder_layer_forward.12
= control target key start
LH: loop header
LB: loop body
LE: loop exit
PB: predicated region body
PF: predicated region fallthrough
CT: control target
= control target key end

     0   :  { %8 = vsyncpa [#allocation3], 0  ;;  %s123_s15 = smov [#allocation2]   ;;  %s124_s17 = smov 64   ;;  %s164_s0 = inlined_call_operand.vmem [shape: f32[16,32], index: 0, kind: input, shape index: {}]   ;;  %s165_s1 = inlined_call_operand.hbm [shape: bf16[32,64], index: 1, kind: input, shape index: {}]   ;;  %s166_s2 = inlined_call_operand.vmem [shape: f32[1,64], index: 2, kind: input, shape index: {}]   ;;  %s167_s3 = inlined_call_operand.vmem [shape: bf16[16,64], index: 3, kind: output, shape index: {}]  }
   0x1   :  { %s15_s14 = sshll.u32 %s165_s1, 4  ;;  %s17_s16 = sshll.u32 %s123_s15, 4  ;;  %s16_s14 = int_to_ptr.hbm [resolvable:$true] %s15_s14  ;;  %s18_s16 = int_to_ptr.vmem [resolvable:$true] %s17_s16 }
   0x2   :  { %s125_s18 = smov 4  }
   0x3   :  { %23 = dma.hbm_to_vmem [thread:$0]  %s16_s14, 256, %s18_s16, [#allocation3], %s124_s17, %s124_s17, %s125_s18  }
   0x4   :  { %121 = dma.done.wait [#allocation3], 256  }
   0x5   :  { %122 = vsyncadd [#allocation3], 4294967040  ;;  %v92_v0 = vld [vmem:[#allocation2 + $0x8] sm:$0xff]  ;;  %v91_v1 = vld [vmem:[#allocation2] sm:$0xff]  ;;  %vm54_vm0 = vcmask 261120   ;;  %vm74_vm1 = vcmask 519168  }
   0x6   :  { %64 = vmatpush.bf16.msra.mxu0 %v92_v0  ;;  %v31_v2 = vld [vmem:[%s164_s0] sm:$0xff]  ;;  %v32_v3 = vld [vmem:[%s164_s0 + $0x8] sm:$0xff] }
   0x7   :  { %v33_v4 = vpack.c.bf16 %v32_v3, %v31_v2  ;;  %v96_v5 = vld [vmem:[%s166_s2] ss:$0 sm:$0xff] }
   0xa   :  { %65 = vmatpush.bf16.msra.mxu0 %v91_v1 }
   0xd   :  { %90 = vmatmul.msk.bf16.vlgmr.msra.gmra.mxu0 %vm54_vm0, %v33_v4 }
  0x8a   :  { %v67_v6 = vpop.f32.mrf.mxu0 }
  0x8b   :  { %v68_v7 = vadd.f32 %v96_v5, %v67_v6 }
  0x8d   :  { %v72_v8 = vpack.c.bf16 %v68_v7, %v68_v7 }
  0x8f   :  { %75 = vst.msk [vmem:[%s167_s3] sm:$0xf] %vm74_vm1, %v72_v8 }
  0x92   :  { %v69_v9 = vpop.f32.mrf.mxu0 }
  0x93   :  { %v70_v10 = vadd.f32 %v96_v5, %v69_v9 }
  0x95   :  { %v73_v11 = vpack.c.bf16 %v70_v10, %v70_v10 }
  0x97   :  { %76 = vst.msk [vmem:[%s167_s3 + $0x4] sm:$0xf] %vm74_vm1, %v73_v11 }
  0x98   :  { %81 = vsyncpa [#allocation3], 1 }

// kernel: decoder_layer_forward.14
= control target key start
LH: loop header
LB: loop body
LE: loop exit
PB: predicated region body
PF: predicated region fallthrough
CT: control target
= control target key end

     0   :  { %vm51_vm0 = vcmask 261120   ;;  %v188_v10 = vmov 32.0   ;;  %v189_v27 = vmov 31.0   ;;  %s262_s2 = inlined_call_operand.vmem [shape: bf16[32,32], index: 2, kind: input, shape index: {}]   ;;  %s263_s3 = inlined_call_operand.vmem [shape: f32[1,32], index: 3, kind: input, shape index: {}]   ;;  %s264_s0 = inlined_call_operand.vmem [shape: bf16[16,32], index: 0, kind: input, shape index: {}]   ;;  %s265_s4 = inlined_call_operand.vmem [shape: f32[1,32], index: 4, kind: input, shape index: {}]   ;;  %s266_s5 = inlined_call_operand.vmem [shape: f32[1,32], index: 5, kind: input, shape index: {}]   ;;  %s267_s1 = inlined_call_operand.vmem [shape: f32[16,32], index: 1, kind: input, shape index: {}]   ;;  %s268_s6 = inlined_call_operand.vmem [shape: f32[16,32], index: 6, kind: output, shape index: {}]  }
   0x1   :  { %v170_v0 = vld [vmem:[%s262_s2 + $0x8] sm:$0xff]  ;;  %v169_v1 = vld [vmem:[%s262_s2] sm:$0xff]  ;;  %176 = vrcp.f32 %v188_v10 }
   0x2   :  { %61 = vmatpush.bf16.msra.mxu0 %v170_v0  ;;  %v168_v2 = vld [vmem:[%s264_s0] sm:$0xff]  ;;  %178 = vrcp.f32 %v189_v27 }
   0x3   :  { %v173_v3 = vld [vmem:[%s263_s3] ss:$0 sm:$0xff] }
   0x4   :  { %v174_v55 = vld [vmem:[%s265_s4] ss:$0 sm:$0xff] }
   0x5   :  { %v175_v60 = vld [vmem:[%s266_s5] ss:$0 sm:$0xff] }
   0x6   :  { %62 = vmatpush.bf16.msra.mxu0 %v169_v1  ;;  %v145_v1 = vld [vmem:[%s267_s1] sm:$0xff] }
   0x7   :  { %v177_v11 = vpop.eup %176 }
   0x8   :  { %v78_v12 = vmul.f32 32.0, %v177_v11  ;;  %vm82_vm1 = vweird.f32 %v177_v11  ;;  %v179_v28 = vpop.eup %178 }
   0x9   :  { %167 = vmatmul.msk.bf16.vlgmr.msra.gmra.mxu0 %vm51_vm0, %v168_v2  ;;  %v97_v29 = vmul.f32 31.0, %v179_v28  ;;  %vm101_vm2 = vweird.f32 %v179_v28 }
   0xa   :  { %v79_v13 = vsub.f32 1.0, %v78_v12 }
   0xb   :  { %v98_v30 = vsub.f32 1.0, %v97_v29 }
   0xc   :  { %v80_v14 = vmul.f32 %v177_v11, %v79_v13 }
   0xd   :  { %v99_v31 = vmul.f32 %v179_v28, %v98_v30 }
   0xe   :  { %v81_v15 = vadd.f32 %v177_v11, %v80_v14 }
   0xf   :  { %v100_v32 = vadd.f32 %v179_v28, %v99_v31 }
  0x10   :  { %v83_v16 = vsel %vm82_vm1, %v177_v11, %v81_v15 }
  0x11   :  { %v102_v33 = vsel %vm101_vm2, %v179_v28, %v100_v32 }
  0x86   :  { %v64_v4 = vpop.f32.mrf.mxu0 }
  0x87   :  { %v65_v5 = vadd.f32 %v173_v3, %v64_v4 }
  0x89   :  { %v71_v6 = vsel %vm51_vm0, %v65_v5, 0.0 }
  0x8a   :  { %72 = vadd.xlane.f32.xlu0 %v71_v6 }
  0x8e   :  { %v66_v7 = vpop.f32.mrf.mxu0 }
  0x8f   :  { %v67_v8 = vadd.f32 %v173_v3, %v66_v7  ;;  %v146_v7 = vld [vmem:[%s267_s1 + $0x8] sm:$0xff] }
  0x91   :  { %v74_v9 = vsel %vm51_vm0, %v67_v8, 0.0 }
  0x92   :  { %75 = vadd.xlane.f32.xlu0 %v74_v9 }
  0xfd   :  { %v73_v17 = vpop.xlane.xlu0 %72 }
  0xfe   :  { %v84_v18 = vmul.f32 %v83_v16, %v73_v17 }
 0x100   :  { %v86_v19 = vsub.f32 %v65_v5, %v84_v18 }
 0x102   :  { %v88_v20 = vmul.f32 %v86_v19, %v86_v19  ;;  %v136_v59 = vmul.f32 %v174_v55, %v86_v19 }
 0x104   :  { %v90_v21 = vsel %vm51_vm0, %v88_v20, 0.0 }
 0x105   :  { %91 = vadd.xlane.f32.xlu1 %v90_v21  ;;  %v76_v22 = vpop.xlane.xlu0 %75 }
 0x106   :  { %v85_v23 = vmul.f32 %v83_v16, %v76_v22 }
 0x108   :  { %v87_v24 = vsub.f32 %v67_v8, %v85_v23 }
 0x10a   :  { %v89_v25 = vmul.f32 %v87_v24, %v87_v24  ;;  %v137_v4 = vmul.f32 %v174_v55, %v87_v24 }
 0x10c   :  { %v93_v26 = vsel %vm51_vm0, %v89_v25, 0.0 }
 0x10d   :  { %94 = vadd.xlane.f32.xlu1 %v93_v26 }
 0x178   :  { %v92_v34 = vpop.xlane.xlu1 %91 }
 0x179   :  { %v103_v35 = vmul.f32 %v102_v33, %v92_v34 }
 0x17b   :  { %180 = vrsqrt.f32 %v103_v35  ;;  %vm112_vm3 = vcmp.eq.f32.partialorder %v103_v35, inf  ;;  %v115_v48 = vand.u32 2147483648, %v103_v35  ;;  %vm114_vm4 = vcmp.eq.f32.partialorder %v103_v35, 0.0 }
 0x180   :  { %v95_v36 = vpop.xlane.xlu1 %94 }
 0x181   :  { %v181_v37 = vpop.eup %180  ;;  %v104_v38 = vmul.f32 %v102_v33, %v95_v36 }
 0x182   :  { %v106_v39 = vmul.f32 %v181_v37, %v103_v35 }
 0x183   :  { %182 = vrsqrt.f32 %v104_v38  ;;  %vm124_vm5 = vcmp.eq.f32.partialorder %v104_v38, inf  ;;  %v127_v57 = vand.u32 2147483648, %v104_v38  ;;  %vm126_vm6 = vcmp.eq.f32.partialorder %v104_v38, 0.0 }
 0x184   :  { %v107_v40 = vmul.f32 %v181_v37, %v106_v39 }
 0x186   :  { %v108_v41 = vmul.f32 0.5, %v107_v40 }
 0x188   :  { %v109_v42 = vsub.f32 1.5, %v108_v41 }
 0x189   :  { %v183_v43 = vpop.eup %182 }
 0x18a   :  { %v110_v44 = vmul.f32 %v181_v37, %v109_v42  ;;  %v118_v45 = vmul.f32 %v183_v43, %v104_v38 }
 0x18c   :  { %v111_v46 = vmul.f32 %v110_v44, %v103_v35  ;;  %v119_v47 = vmul.f32 %v183_v43, %v118_v45 }
 0x18e   :  { %v113_v49 = vsel %vm112_vm3, %v103_v35, %v111_v46  ;;  %v120_v50 = vmul.f32 0.5, %v119_v47 }
 0x18f   :  { %v116_v51 = vsel %vm114_vm4, %v115_v48, %v113_v49 }
 0x190   :  { %v129_v52 = vadd.f32 1e-06, %v116_v51  ;;  %v121_v53 = vsub.f32 1.5, %v120_v50 }
 0x192   :  { %184 = vrcp.f32 %v129_v52  ;;  %v122_v54 = vmul.f32 %v183_v43, %v121_v53 }
 0x194   :  { %v123_v56 = vmul.f32 %v122_v54, %v104_v38 }
 0x196   :  { %v125_v58 = vsel %vm124_vm5, %v104_v38, %v123_v56 }
 0x197   :  { %v128_v61 = vsel %vm126_vm6, %v127_v57, %v125_v58 }
 0x198   :  { %v185_v62 = vpop.eup %184  ;;  %v130_v63 = vadd.f32 1e-06, %v128_v61 }
 0x199   :  { %v138_v0 = vmul.f32 %v185_v62, %v136_v59 }
 0x19a   :  { %186 = vrcp.f32 %v130_v63 }
 0x19b   :  { %v143_v2 = vadd.f32 %v175_v60, %v138_v0 }
 0x19d   :  { %v147_v3 = vadd.f32 %v145_v1, %v143_v2 }
 0x19f   :  { %149 = vst.msk [vmem:[%s268_s6] sm:$0xff] %vm51_vm0, %v147_v3 }
 0x1a0   :  { %v187_v5 = vpop.eup %186 }
 0x1a1   :  { %v139_v6 = vmul.f32 %v187_v5, %v137_v4 }
 0x1a3   :  { %v144_v8 = vadd.f32 %v175_v60, %v139_v6 }
 0x1a5   :  { %v148_v9 = vadd.f32 %v146_v7, %v144_v8 }
 0x1a7   :  { %150 = vst.msk [vmem:[%s268_s6 + $0x8] sm:$0xff] %vm51_vm0, %v148_v9 }

// kernel: decoder_layer_forward.13
= control target key start
LH: loop header
LB: loop body
LE: loop exit
PB: predicated region body
PF: predicated region fallthrough
CT: control target
= control target key end

     0   :  { %s627_s12 = smov 0   ;;  %s704_s0 = inlined_call_operand.vmem [shape: s32[2,1,8], index: 0, kind: input, shape index: {}]   ;;  %s705_s1 = inlined_call_operand.vmem [shape: bf16[2,8,32], index: 1, kind: input, shape index: {}]   ;;  %s706_s2 = inlined_call_operand.vmem [shape: bf16[2,8,64], index: 2, kind: input, shape index: {}]   ;;  %s707_s3 = inlined_call_operand.vmem [shape: bf16[2,8,32], index: 3, kind: output, shape index: {}]  }
   0x1 LB: > { %s535_s13 = sadd.s32 4294967295, %s594_s12   ;;  %p539_p0 = scmp.ge.s32.totalorder %s594_s12, 1  ;;  %s594_s12 = sphi %s627_s12, %s13_s12  }
   0x2   : > { %p153_p1 = scmp.lt.s32.totalorder %s594_s12, 3 }
   0x4   : > { %p154_p2 = pnand %p539_p0, %p153_p1 }
   0x5   : > { %p182_p3 = scmp.lt.s32.totalorder (!%p154_p2), %s535_s13, 1  ;;  %s596_s21 = smov (!%p154_p2), 96  }
   0x6   : > { %157 = sbr.rel (%p154_p2) target bundleno = 1080 (0x438), region = 32  ;;  %s597_s22 = smov (!%p154_p2), 112  }
   0x7   : > { %s598_s23 = smov (!%p154_p2), 104   ;;  %s600_s27 = smov (!%p154_p2), 120  }
   0x8   : > { %s601_s28 = smov (!%p154_p2), 88   ;;  %s602_s29 = smov (!%p154_p2), 80  }
   0x9   : > { %s603_s30 = smov (!%p154_p2), 72   ;;  %s604_s4 = smov (!%p154_p2), 8  }
   0xa   : > { %s605_s5 = smov (!%p154_p2), 24   ;;  %s606_s6 = smov (!%p154_p2), 16  }
   0xb   : > { %s711_s13 = smov (!%p182_p3, %s535_s13), 1  ;;  %vm202_vm0 = vcmask 64512   ;;  %v599_v8 = vmov 0   ;;  %vm247_vm3 = vcmask 1043456   ;;  %vm454_vm4 = vcmask 130048  }
   0xc   : > { %s635_s14 = sshll.u32 %s711_s13, 2  ;;  %s184_s26 = scalar_lea.vmem %s704_s0, %s711_s13  ;;  %vm456_vm5 = vcmask 195584   ;;  %vm459_vm6 = vcmask 257024  }
   0xd   : > { %s192_s17 = scalar_lea.vmem %s706_s2, %s635_s14  ;;  %s188_s20 = scalar_lea.vmem %s705_s1, %s635_s14  ;;  %v200_v7 = vld [vmem:[%s184_s26] sm:$0x1] }
   0xe   : > { %v199_v0 = vld [vmem:[%s192_s17] sm:$0xf]  ;;  %vm201_vm1 = vcmp.eq.s32.totalorder %v200_v7, 0  ;;  %s196_s9 = scalar_lea.vmem %s707_s3, %s635_s14 }
   0xf   : > { %v207_v1 = vsel %vm202_vm0, %v199_v0, 0  ;;  %v198_v2 = vld [vmem:[%s188_s20] sm:$0xf]  ;;  %v240_v3 = vunpack.c.l.b16 %v199_v0  ;;  %v223_v9 = vsel %vm201_vm1, 1, %v599_v8 }
  0x10   : > { %216 = vmatpush.bf16.xpose.msra.mxu0 %v207_v1  ;;  %v265_v5 = vunpack.c.l.b16 %v198_v2  ;;  %v224_v10 = vperm.slane %v223_v9, 0 }
  0x11   : > { %v647_v4 = vpack.c.b16 %v240_v3, %v240_v3 }
  0x12   : > { %v266_v6 = vpack.c.b16 %v265_v5, %v265_v5  ;;  %vm655_vm2 = vcmp.eq.s32.totalorder %v224_v10, 1 }
  0x13   : > { %242 = vrot.lane.b32.xlu2 %v647_v4, %s596_s21 }
  0x17   : > { %543 = vmatmul.msk.bf16.vlgmr.msra.gmra.mxu0 %vm202_vm0, %v198_v2 }
  0x1b   : > { %327 = vrot.lane.b32.xlu2 %v647_v4, %s597_s22 }
  0x23   : > { %385 = vrot.lane.b32.xlu2 %v647_v4, %s598_s23 }
  0x2b   : > { %325 = vrot.lane.b32.xlu2 %v266_v6, %s597_s22 }
  0x6d   : > { %v243_v17 = vpop.permute.xlu2 %242 }
  0x6e   : > { %v249_v28 = vsel %vm247_vm3, %v243_v17, 0 }
  0x6f   : > { %258 = vmatpush.bf16.msra.mxu1 %v249_v28 }
  0x75   : > { %v328_v18 = vpop.permute.xlu2 %327 }
  0x76   : > { %v333_v29 = vsel %vm202_vm0, %v328_v18, 0 }
  0x77   : > { %342 = vmatpush.bf16.xpose.msrb.mxu1 %v333_v29 }
  0x7d   : > { %v386_v22 = vpop.permute.xlu2 %385 }
  0x7e   : > { %v391_v23 = vsel %vm202_vm0, %v386_v22, 0 }
  0x7f   : > { %400 = vmatpush.bf16.xpose.msrb.mxu0 %v391_v23 }
  0x85   : > { %v326_v36 = vpop.permute.xlu2 %325 }
  0x94   : > { %v218_v11 = vpop.f32.mrf.mxu0 }
  0x95   : > { %v222_v13 = vmul.f32 0.35355338, %v218_v11 }
  0x97   : > { %v226_v14 = vsel %vm655_vm2, -1e+09, %v222_v13 }
  0x98   : > { %v227_v15 = vsel %vm202_vm0, %v226_v14, -inf }
  0x99   : > { %228 = vmax.xlane.f32.xlu0 %v227_v15 }
  0x9c   : > { %v220_v16 = vpop.f32.mrf.mxu0 }
  0xad   : > { %269 = vrot.lane.b32.xlu0 %v647_v4, %s600_s27 }
  0xb5   : > { %383 = vrot.lane.b32.xlu0 %v266_v6, %s598_s23 }
 0x10c   : > { %v229_v19 = vpop.xlane.xlu0 %228 }
 0x10d   : > { %v230_v20 = vsub.f32 %v226_v14, %v229_v19 }
 0x10f   : > { %v231_v21 = vmul.f32 1.442695, %v230_v20 }
 0x111   : > { %572 = vpow2.f32 %v231_v21 }
 0x117   : > { %v573_v24 = vpop.eup %572 }
 0x118   : > { %v233_v25 = vsel %vm202_vm0, %v573_v24, 0.0 }
 0x119   : > { %234 = vadd.xlane.f32.xlu1 %v233_v25 }
 0x11f   : > { %v270_v26 = vpop.permute.xlu0 %269 }
 0x120   : > { %v275_v30 = vsel %vm202_vm0, %v270_v26, 0 }
 0x121   : > { %284 = vmatpush.bf16.xpose.msra.mxu2 %v275_v30 }
 0x127   : > { %v384_v27 = vpop.permute.xlu0 %383 }
 0x128   : > { %549 = vmatmul.msk.bf16.vlgmr.msrb.gmra.mxu0 %vm202_vm0, %v384_v27 }
 0x132   : > { %267 = vrot.lane.b32.xlu1 %v266_v6, %s600_s27 }
 0x18c   : > { %v235_v31 = vpop.xlane.xlu1 %234 }
 0x18d   : > { %574 = vrcp.f32 %v235_v31 }
 0x193   : > { %v575_v32 = vpop.eup %574 }
 0x194   : > { %v237_v33 = vmul.f32 %v575_v32, %v573_v24 }
 0x196   : > { %v238_v34 = vpack.c.bf16 %v237_v33, %v237_v33 }
 0x198   : > { %544 = vmatmul.msk.bf16.vlgmr.msra.gmra.mxu1 %vm202_vm0, %v238_v34 }
 0x1a4   : > { %v268_v35 = vpop.permute.xlu1 %267 }
 0x1a5   : > { %545 = vmatmul.msk.bf16.vlgmr.msra.gmra.mxu2 %vm202_vm0, %v268_v35  ;;  %v402_v37 = vpop.f32.mrf.mxu0 }
 0x1a6   : > { %v406_v38 = vmul.f32 0.35355338, %v402_v37 }
 0x1a8   : > { %547 = vmatmul.msk.bf16.vlgmr.msrb.gmra.mxu1 %vm202_vm0, %v326_v36  ;;  %v407_v39 = vsel %vm655_vm2, -1e+09, %v406_v38 }
 0x1a9   : > { %v408_v40 = vsel %vm202_vm0, %v407_v39, -inf }
 0x1aa   : > { %409 = vmax.xlane.f32.xlu0 %v408_v40 }
 0x1ad   : > { %v404_v41 = vpop.f32.mrf.mxu0 }
 0x215   : > { %v675_v42 = vpop.f32.mrf.mxu1 }
 0x21d   : > { %v262_v43 = vpop.f32.mrf.mxu1  ;;  %v410_v56 = vpop.xlane.xlu0 %409 }
 0x21e   : > { %v411_v60 = vsub.f32 %v407_v39, %v410_v56 }
 0x220   : > { %v412_v62 = vmul.f32 1.442695, %v411_v60 }
 0x225   : > { %v344_v44 = vpop.f32.mrf.mxu1 }
 0x226   : > { %v348_v45 = vmul.f32 0.35355338, %v344_v44 }
 0x228   : > { %v286_v46 = vpop.f32.mrf.mxu2  ;;  %v349_v47 = vsel %vm655_vm2, -1e+09, %v348_v45 }
 0x229   : > { %v290_v48 = vmul.f32 0.35355338, %v286_v46  ;;  %v350_v49 = vsel %vm202_vm0, %v349_v47, -inf }
 0x22a   : > { %351 = vmax.xlane.f32.xlu1 %v350_v49 }
 0x22b   : > { %v291_v50 = vsel %vm655_vm2, -1e+09, %v290_v48 }
 0x22c   : > { %v292_v51 = vsel %vm202_vm0, %v291_v50, -inf }
 0x22d   : > { %v346_v52 = vpop.f32.mrf.mxu1  ;;  %293 = vmax.xlane.f32.xlu2 %v292_v51 }
 0x230   : > { %v288_v53 = vpop.f32.mrf.mxu2 }
 0x243   : > { %304 = vrot.lane.b32.xlu1 %v647_v4, %s601_s28 }
 0x29d   : > { %v352_v54 = vpop.xlane.xlu1 %351 }
 0x29e   : > { %v353_v55 = vsub.f32 %v349_v47, %v352_v54 }
 0x2a0   : > { %v354_v57 = vmul.f32 1.442695, %v353_v55  ;;  %v294_v58 = vpop.xlane.xlu2 %293 }
 0x2a1   : > { %v295_v59 = vsub.f32 %v291_v50, %v294_v58 }
 0x2a2   : > { %576 = vpow2.f32 %v354_v57 }
 0x2a3   : > { %v296_v61 = vmul.f32 1.442695, %v295_v59 }
 0x2a5   : > { %578 = vpow2.f32 %v296_v61 }
 0x2a6   : > { %580 = vpow2.f32 %v412_v62 }
 0x2a8   : > { %v577_v63 = vpop.eup %576 }
 0x2a9   : > { %v356_v0 = vsel %vm202_vm0, %v577_v63, 0.0 }
 0x2aa   : > { %357 = vadd.xlane.f32.xlu0 %v356_v0 }
 0x2ab   : > { %v579_v1 = vpop.eup %578 }
 0x2ac   : > { %v298_v2 = vsel %vm202_vm0, %v579_v1, 0.0  ;;  %v581_v3 = vpop.eup %580 }
 0x2ad   : > { %299 = vadd.xlane.f32.xlu2 %v298_v2  ;;  %v414_v5 = vsel %vm202_vm0, %v581_v3, 0.0 }
 0x2b5   : > { %415 = vadd.xlane.f32.xlu2 %v414_v5  ;;  %v305_v6 = vpop.permute.xlu1 %304 }
 0x2b6   : > { %v310_v7 = vsel %vm247_vm3, %v305_v6, 0 }
 0x2b7   : > { %319 = vmatpush.bf16.msra.mxu3 %v310_v7 }
 0x2be   : > { %362 = vrot.lane.b32.xlu0 %v647_v4, %s602_s29 }
 0x2cd   : > { %420 = vrot.lane.b32.xlu2 %v647_v4, %s603_s30 }
 0x31d   : > { %v358_v10 = vpop.xlane.xlu0 %357 }
 0x320   : > { %v300_v8 = vpop.xlane.xlu2 %299 }
 0x321   : > { %582 = vrcp.f32 %v300_v8 }
 0x327   : > { %v583_v9 = vpop.eup %582 }
 0x328   : > { %v416_v11 = vpop.xlane.xlu2 %415  ;;  %v302_v12 = vmul.f32 %v583_v9, %v579_v1 }
 0x329   : > { %584 = vrcp.f32 %v416_v11 }
 0x32a   : > { %v303_v13 = vpack.c.bf16 %v302_v12, %v302_v12  ;;  %586 = vrcp.f32 %v358_v10 }
 0x32c   : > { %546 = vmatmul.msk.bf16.vlgmr.msra.gmra.mxu3 %vm202_vm0, %v303_v13 }
 0x32f   : > { %v585_v14 = vpop.eup %584 }
 0x330   : > { %v418_v15 = vmul.f32 %v585_v14, %v581_v3  ;;  %v421_v16 = vpop.permute.xlu2 %420  ;;  %v363_v17 = vpop.permute.xlu0 %362 }
 0x331   : > { %v368_v4 = vsel %vm247_vm3, %v363_v17, 0  ;;  %v426_v18 = vsel %vm247_vm3, %v421_v16, 0  ;;  %v587_v20 = vpop.eup %586 }
 0x332   : > { %377 = vmatpush.bf16.msrb.mxu3 %v368_v4  ;;  %435 = vmatpush.bf16.msrb.mxu2 %v426_v18  ;;  %v419_v19 = vpack.c.bf16 %v418_v15, %v418_v15  ;;  %v360_v21 = vmul.f32 %v587_v20, %v577_v63 }
 0x334   : > { %v361_v22 = vpack.c.bf16 %v360_v21, %v360_v21 }
 0x335   : > { %550 = vmatmul.msk.bf16.vlgmr.msrb.gmra.mxu2 %vm202_vm0, %v419_v19 }
 0x33c   : > { %548 = vmatmul.msk.bf16.vlgmr.msrb.gmra.mxu3 %vm202_vm0, %v361_v22 }
 0x3af   : > { %v321_v23 = vpop.f32.mrf.mxu3 }
 0x3b0   : > { %442 = vrot.lane.b32.xlu1 %v321_v23, %s604_s4 }
 0x3b7   : > { %v323_v24 = vpop.f32.mrf.mxu3 }
 0x3b8   : > { %v437_v25 = vpop.f32.mrf.mxu2 }
 0x3b9   : > { %450 = vrot.lane.b32.xlu1 %v437_v25, %s605_s5 }
 0x3bf   : > { %v379_v26 = vpop.f32.mrf.mxu3 }
 0x3c0   : > { %v439_v27 = vpop.f32.mrf.mxu2  ;;  %446 = vrot.lane.b32.xlu0 %v379_v26, %s606_s6 }
 0x3c7   : > { %v381_v28 = vpop.f32.mrf.mxu3 }
 0x422   : > { %v443_v29 = vpop.permute.xlu1 %442 }
 0x423   : > { %v453_v30 = vsel %vm202_vm0, %v675_v42, %v443_v29 }
 0x42b   : > { %v451_v32 = vpop.permute.xlu1 %450 }
 0x432   : > { %v447_v31 = vpop.permute.xlu0 %446 }
 0x433   : > { %v455_v33 = vsel %vm454_vm4, %v453_v30, %v447_v31 }
 0x434   : > { %v457_v34 = vsel %vm456_vm5, %v455_v33, %v451_v32 }
 0x435   : > { %v458_v35 = vpack.c.bf16 %v457_v34, %v457_v34 }
 0x437   : > { %460 = vst.msk [vmem:[%s196_s9] sm:$0xf] %vm459_vm6, %v458_v35 }
 0x438 PF: > { %s13_s12 = sadd.s32 1, %s594_s12  }
 0x439   : > { %p10_p4 = scmp.ge.s32.totalorder %s13_s12, 4  }
 0x43b   :  { %12 = sbr.rel (!%p10_p4) target bundleno = 1 (0x1), region = 68 }

// kernel: decoder_layer_forward.15
= control target key start
LH: loop header
LB: loop body
LE: loop exit
PB: predicated region body
PF: predicated region fallthrough
CT: control target
= control target key end

     0   :  { %s402_s0 = inlined_call_operand.vmem [shape: f32[16,32], index: 0, kind: input, shape index: {}]   ;;  %s403_s1 = inlined_call_operand.vmem [shape: bf16[32,64], index: 1, kind: input, shape index: {}]   ;;  %s404_s2 = inlined_call_operand.vmem [shape: f32[1,64], index: 2, kind: input, shape index: {}]   ;;  %s405_s3 = inlined_call_operand.vmem [shape: bf16[64,32], index: 3, kind: input, shape index: {}]   ;;  %s406_s4 = inlined_call_operand.vmem [shape: f32[1,32], index: 4, kind: input, shape index: {}]   ;;  %s407_s5 = inlined_call_operand.vmem [shape: f32[1,32], index: 5, kind: input, shape index: {}]   ;;  %s408_s6 = inlined_call_operand.vmem [shape: f32[1,32], index: 6, kind: input, shape index: {}]   ;;  %s409_s7 = inlined_call_operand.hbm [shape: f32[16,32], index: 7, kind: output, shape index: {}]  }
   0x1   :  { %v251_v0 = vld [vmem:[%s403_s1 + $0x8] sm:$0xff]  ;;  %v250_v1 = vld [vmem:[%s403_s1] sm:$0xff] }
   0x2   :  { %v357_v2 = vld [vmem:[%s402_s0] sm:$0xff]  ;;  %v362_v3 = vld [vmem:[%s402_s0 + $0x8] sm:$0xff]  ;;  %61 = vmatpush.bf16.msra.mxu0 %v251_v0 }
   0x3   :  { %12 = vsyncpa [#allocation3], 0  ;;  %v30_v4 = vpack.c.bf16 %v362_v3, %v357_v2  ;;  %vm51_vm0 = vcmask 261120   ;;  %v255_v5 = vld [vmem:[%s405_s3 + $0x18] sm:$0xff]  ;;  %v254_v6 = vld [vmem:[%s405_s3 + $0x10] sm:$0xff]  ;;  %vm108_vm1 = vcmask 523264  }
   0x4   :  { %116 = vmatpush.bf16.msra.mxu1 %v255_v5  ;;  %v253_v7 = vld [vmem:[%s405_s3 + $0x8] sm:$0xff]  ;;  %v252_v8 = vld [vmem:[%s405_s3] sm:$0xff]  ;;  %v303_v24 = vmov 32.0   ;;  %v304_v41 = vmov 31.0   ;;  %s212_s23 = sshll.u32 %s409_s7, 4  ;;  %s307_s24 = smov 8   ;;  %s213_s23 = int_to_ptr.hbm [resolvable:$true] %s212_s23 }
   0x5   :  { %v261_v10 = vld [vmem:[%s404_s2] ss:$0 sm:$0xff]  ;;  %265 = vrcp.f32 %v303_v24 }
   0x6   :  { %62 = vmatpush.bf16.msra.mxu0 %v250_v1  ;;  %v262_v17 = vld [vmem:[%s406_s4] ss:$0 sm:$0xff]  ;;  %267 = vrcp.f32 %v304_v41 }
   0x8   :  { %117 = vmatpush.bf16.msra.mxu1 %v254_v6 }
   0x9   :  { %232 = vmatmul.msk.bf16.vlgmr.msra.gmra.mxu0 %vm51_vm0, %v30_v4 }
   0xb   :  { %v266_v25 = vpop.eup %265 }
   0xc   :  { %118 = vmatpush.bf16.msra.mxu1 %v253_v7  ;;  %v135_v26 = vmul.f32 32.0, %v266_v25  ;;  %vm139_vm2 = vweird.f32 %v266_v25  ;;  %v268_v42 = vpop.eup %267  ;;  %v263_v7 = vld [vmem:[%s407_s5] ss:$0 sm:$0xff]  ;;  %s305_s5 = smov [#allocation2]  }
   0xd   :  { %v154_v43 = vmul.f32 31.0, %v268_v42  ;;  %vm158_vm3 = vweird.f32 %v268_v42  ;;  %s210_s20 = sshll.u32 %s305_s5, 4  ;;  %s211_s20 = int_to_ptr.vmem [resolvable:$true] %s210_s20 }
   0xe   :  { %v136_v27 = vsub.f32 1.0, %v135_v26 }
   0xf   :  { %v155_v44 = vsub.f32 1.0, %v154_v43 }
  0x10   :  { %119 = vmatpush.bf16.msra.mxu1 %v252_v8  ;;  %v137_v28 = vmul.f32 %v266_v25, %v136_v27 }
  0x11   :  { %v156_v45 = vmul.f32 %v268_v42, %v155_v44 }
  0x12   :  { %v138_v29 = vadd.f32 %v266_v25, %v137_v28 }
  0x13   :  { %v157_v46 = vadd.f32 %v268_v42, %v156_v45 }
  0x14   :  { %v140_v30 = vsel %vm139_vm2, %v266_v25, %v138_v29 }
  0x15   :  { %v159_v47 = vsel %vm158_vm3, %v268_v42, %v157_v46 }
  0x86   :  { %v64_v9 = vpop.f32.mrf.mxu0 }
  0x87   :  { %v65_v11 = vadd.f32 %v261_v10, %v64_v9 }
  0x89   :  { %v69_v14 = vmax.f32 %v65_v11, 0.0 }
  0x8e   :  { %v66_v12 = vpop.f32.mrf.mxu0 }
  0x8f   :  { %v67_v13 = vadd.f32 %v261_v10, %v66_v12 }
  0x91   :  { %v70_v15 = vmax.f32 %v67_v13, 0.0  ;;  %v264_v13 = vld [vmem:[%s408_s6] ss:$0 sm:$0xff]  ;;  %s306_s6 = smov 128  }
  0x93   :  { %v71_v16 = vpack.c.bf16 %v70_v15, %v69_v14 }
  0x95   :  { %249 = vmatmul.msk.bf16.vlgmr.msra.gmra.mxu1 %vm108_vm1, %v71_v16 }
 0x112   :  { %v121_v18 = vpop.f32.mrf.mxu1 }
 0x113   :  { %v122_v19 = vadd.f32 %v262_v17, %v121_v18 }
 0x115   :  { %v128_v20 = vsel %vm51_vm0, %v122_v19, 0.0 }
 0x116   :  { %129 = vadd.xlane.f32.xlu0 %v128_v20 }
 0x11a   :  { %v123_v21 = vpop.f32.mrf.mxu1 }
 0x11b   :  { %v124_v22 = vadd.f32 %v262_v17, %v123_v21 }
 0x11d   :  { %v131_v23 = vsel %vm51_vm0, %v124_v22, 0.0 }
 0x11e   :  { %132 = vadd.xlane.f32.xlu0 %v131_v23 }
 0x189   :  { %v130_v31 = vpop.xlane.xlu0 %129 }
 0x18a   :  { %v141_v32 = vmul.f32 %v140_v30, %v130_v31 }
 0x18c   :  { %v143_v33 = vsub.f32 %v122_v19, %v141_v32 }
 0x18e   :  { %v145_v34 = vmul.f32 %v143_v33, %v143_v33  ;;  %v193_v11 = vmul.f32 %v263_v7, %v143_v33 }
 0x190   :  { %v147_v35 = vsel %vm51_vm0, %v145_v34, 0.0 }
 0x191   :  { %148 = vadd.xlane.f32.xlu1 %v147_v35  ;;  %v133_v36 = vpop.xlane.xlu0 %132 }
 0x192   :  { %v142_v37 = vmul.f32 %v140_v30, %v133_v36 }
 0x194   :  { %v144_v38 = vsub.f32 %v124_v22, %v142_v37 }
 0x196   :  { %v146_v39 = vmul.f32 %v144_v38, %v144_v38  ;;  %v194_v19 = vmul.f32 %v263_v7, %v144_v38 }
 0x198   :  { %v150_v40 = vsel %vm51_vm0, %v146_v39, 0.0 }
 0x199   :  { %151 = vadd.xlane.f32.xlu1 %v150_v40 }
 0x204   :  { %v149_v48 = vpop.xlane.xlu1 %148 }
 0x205   :  { %v160_v49 = vmul.f32 %v159_v47, %v149_v48 }
 0x207   :  { %269 = vrsqrt.f32 %v160_v49  ;;  %vm169_vm4 = vcmp.eq.f32.partialorder %v160_v49, inf  ;;  %v172_v62 = vand.u32 2147483648, %v160_v49  ;;  %vm171_vm5 = vcmp.eq.f32.partialorder %v160_v49, 0.0 }
 0x20c   :  { %v152_v50 = vpop.xlane.xlu1 %151 }
 0x20d   :  { %v270_v51 = vpop.eup %269  ;;  %v161_v52 = vmul.f32 %v159_v47, %v152_v50 }
 0x20e   :  { %v163_v53 = vmul.f32 %v270_v51, %v160_v49 }
 0x20f   :  { %271 = vrsqrt.f32 %v161_v52  ;;  %vm181_vm6 = vcmp.eq.f32.partialorder %v161_v52, inf  ;;  %v184_v9 = vand.u32 2147483648, %v161_v52  ;;  %vm183_vm7 = vcmp.eq.f32.partialorder %v161_v52, 0.0 }
 0x210   :  { %v164_v54 = vmul.f32 %v270_v51, %v163_v53 }
 0x212   :  { %v165_v55 = vmul.f32 0.5, %v164_v54 }
 0x214   :  { %v166_v56 = vsub.f32 1.5, %v165_v55 }
 0x215   :  { %v272_v57 = vpop.eup %271 }
 0x216   :  { %v167_v58 = vmul.f32 %v270_v51, %v166_v56  ;;  %v175_v59 = vmul.f32 %v272_v57, %v161_v52 }
 0x218   :  { %v168_v60 = vmul.f32 %v167_v58, %v160_v49  ;;  %v176_v61 = vmul.f32 %v272_v57, %v175_v59 }
 0x21a   :  { %v170_v63 = vsel %vm169_vm4, %v160_v49, %v168_v60  ;;  %v177_v0 = vmul.f32 0.5, %v176_v61 }
 0x21b   :  { %v173_v1 = vsel %vm171_vm5, %v172_v62, %v170_v63 }
 0x21c   :  { %v178_v4 = vsub.f32 1.5, %v177_v0  ;;  %v186_v5 = vadd.f32 1e-06, %v173_v1 }
 0x21e   :  { %v179_v6 = vmul.f32 %v272_v57, %v178_v4  ;;  %273 = vrcp.f32 %v186_v5 }
 0x220   :  { %v180_v8 = vmul.f32 %v179_v6, %v161_v52 }
 0x222   :  { %v182_v10 = vsel %vm181_vm6, %v161_v52, %v180_v8 }
 0x223   :  { %v185_v12 = vsel %vm183_vm7, %v184_v9, %v182_v10 }
 0x224   :  { %v274_v14 = vpop.eup %273  ;;  %v187_v15 = vadd.f32 1e-06, %v185_v12 }
 0x225   :  { %v195_v16 = vmul.f32 %v274_v14, %v193_v11 }
 0x226   :  { %275 = vrcp.f32 %v187_v15 }
 0x227   :  { %v200_v17 = vadd.f32 %v264_v13, %v195_v16 }
 0x229   :  { %v202_v18 = vadd.f32 %v200_v17, %v357_v2 }
 0x22b   :  { %204 = vst.msk [vmem:[#allocation2] sm:$0xff] %vm51_vm0, %v202_v18 }
 0x22c   :  { %v276_v20 = vpop.eup %275 }
 0x22d   :  { %v196_v21 = vmul.f32 %v276_v20, %v194_v19 }
 0x22f   :  { %v201_v22 = vadd.f32 %v264_v13, %v196_v21 }
 0x231   :  { %v203_v23 = vadd.f32 %v201_v22, %v362_v3 }
 0x233   :  { %205 = vst.msk [vmem:[#allocation2 + $0x8] sm:$0xff] %vm51_vm0, %v203_v23 }
 0x234   :  { %218 = dma.vmem_to_hbm [thread:$0]  %s211_s20, 256, %s213_s23, [#allocation3], %s306_s6, %s306_s6, %s307_s24  }
 0x235   :  { %301 = dma.done.wait [#allocation3], 256  }
 0x236   :  { %302 = vsyncadd [#allocation3], 4294967040 }
 0x237   :  { %223 = vsyncpa [#allocation3], 1 }

</bundles_post_ra>
